<compile_context>
chip_gen: v5e
topology: v5e:2x2
jax: 0.10.0
libtpu: 0.0.40
codegen_flags: <defaults>
</compile_context>

<pallas_src>
import math

import jax
import jax.numpy as jnp
from jax.experimental import pallas as pl
from jax.experimental.pallas import tpu as pltpu


# ----------------------------------------------------------------------------
# Model config
# ----------------------------------------------------------------------------
B = 2                      # batch
C = 3                      # image channels
H = W = 16                 # image spatial
P = 8                      # patch size
NP = (H // P) * (W // P)   # 4 vision tokens
CPP = C * P * P            # 192 features per patch
T = 8                      # text sequence length
S = NP + T                 # total sequence length = 12
S_PAD = 16                 # padded rows (multiple of 8 sublanes)
D = 128                    # hidden size
NH = 4                     # attention heads
DH = D // NH               # head dim = 32
F = 256                    # MLP hidden
V = 256                    # vocab size

SCALE = 1.0 / math.sqrt(DH)
LN_EPS = 1e-5


# ----------------------------------------------------------------------------
# Fused decoder kernel: one grid step per batch element
# ----------------------------------------------------------------------------
def fused_decoder_kernel(patches_ref, txt_ref, pos_ref, ln_ref,
                         w_patch_ref, b_patch_ref,
                         w_qkv_ref, b_qkv_ref,
                         w_o_ref, b_o_ref,
                         w_mlp1_ref, b_mlp1_ref,
                         w_mlp2_ref, b_mlp2_ref,
                         w_lm_ref, b_lm_ref,
                         o_ref,
                         h_s, qkv_s, attn_s):
    f32 = jnp.float32
    bf16 = jnp.bfloat16

    def mm(x, w_ref, b_ref):
        # bf16 MXU operands, f32 accumulate, f32 bias add.
        return (jnp.dot(x.astype(bf16), w_ref[...],
                        preferred_element_type=f32)
                + b_ref[...].astype(f32))

    def layer_norm(x, g, b):
        mu = jnp.mean(x, axis=-1, keepdims=True)
        var = jnp.mean(jnp.square(x - mu), axis=-1, keepdims=True)
        return (x - mu) * jax.lax.rsqrt(var + LN_EPS) * g + b

    ln = ln_ref[...].astype(f32)       # [6, D]: ln1_g, ln1_b, ln2_g, ln2_b, lnf_g, lnf_b

    # ---- vision patch embedding + modality fusion + positional embedding ----
    vis = mm(patches_ref[...], w_patch_ref, b_patch_ref)               # [NP, D]
    h_s[0:NP, :] = vis + pos_ref[0:NP, :].astype(f32)
    h_s[NP:S, :] = txt_ref[...].astype(f32) + pos_ref[NP:S, :].astype(f32)
    h_s[S:S_PAD, :] = jnp.zeros((S_PAD - S, D), f32)                   # pad rows
    h = h_s[...]                                                       # [S_PAD, D]

    # ---- attention block ----------------------------------------------------
    qkv_s[...] = mm(layer_norm(h, ln[0:1], ln[1:2]), w_qkv_ref, b_qkv_ref)

    row = jax.lax.broadcasted_iota(jnp.int32, (S_PAD, S_PAD), 0)
    col = jax.lax.broadcasted_iota(jnp.int32, (S_PAD, S_PAD), 1)
    # Causal additive bias; also kills the padded key columns (col >= S > row).
    bias = jnp.where(col <= row, 0.0, -1e30).astype(f32)

    for hh in range(NH):               # heads are contiguous 32-lane slices of D
        qh = qkv_s[:, hh * DH:(hh + 1) * DH]
        kh = qkv_s[:, D + hh * DH:D + (hh + 1) * DH]
        vh = qkv_s[:, 2 * D + hh * DH:2 * D + (hh + 1) * DH]
        s = jax.lax.dot_general(
            qh.astype(bf16), kh.astype(bf16),
            (((1,), (1,)), ((), ())),  # contract DH dims directly (no k.T)
            preferred_element_type=f32) * SCALE + bias
        m = jnp.max(s, axis=-1, keepdims=True)
        p = jnp.exp(s - m)
        l = jnp.sum(p, axis=-1, keepdims=True)
        oh = jnp.dot(p.astype(bf16), vh.astype(bf16),
                     preferred_element_type=f32) * pl.reciprocal(l, approx=True)
        attn_s[:, hh * DH:(hh + 1) * DH] = oh

    h = h + mm(attn_s[...], w_o_ref, b_o_ref)

    # ---- MLP block ----------------------------------------------------------
    m1 = mm(layer_norm(h, ln[2:3], ln[3:4]), w_mlp1_ref, b_mlp1_ref)
    # TODO(synk): PyTorch nn.GELU defaults to the exact erf form; tanh approx is
    # kept here for robust Mosaic lowering.
    m1 = jax.nn.gelu(m1)
    h = h + mm(m1, w_mlp2_ref, b_mlp2_ref)

    # ---- final norm + LM head (lane-dense [S_PAD, V] store) -----------------
    logits = mm(layer_norm(h, ln[4:5], ln[5:6]), w_lm_ref, b_lm_ref)
    o_ref[...] = logits.astype(o_ref.dtype)


# ----------------------------------------------------------------------------
# Parameter init (matmul weights in bf16, elementwise params in f32)
# ----------------------------------------------------------------------------
def init_params(key):
    def dense(k, shape, dtype=jnp.bfloat16, scale=0.02):
        return (scale * jax.random.normal(k, shape)).astype(dtype)

    keys = jax.random.split(key, 12)
    return {
        "w_patch": dense(keys[0], (CPP, D)),
        "b_patch": jnp.zeros((D,), jnp.float32),
        "tok_emb": dense(keys[1], (V, D), dtype=jnp.float32),
        "pos_emb": dense(keys[2], (S, D), dtype=jnp.float32),
        "ln1_g": jnp.ones((D,), jnp.float32),
        "ln1_b": jnp.zeros((D,), jnp.float32),
        "w_qkv": dense(keys[3], (D, 3 * D)),
        "b_qkv": jnp.zeros((3 * D,), jnp.float32),
        "w_o": dense(keys[4], (D, D)),
        "b_o": jnp.zeros((D,), jnp.float32),
        "ln2_g": jnp.ones((D,), jnp.float32),
        "ln2_b": jnp.zeros((D,), jnp.float32),
        "w_mlp1": dense(keys[5], (D, F)),
        "b_mlp1": jnp.zeros((F,), jnp.float32),
        "w_mlp2": dense(keys[6], (F, D)),
        "b_mlp2": jnp.zeros((D,), jnp.float32),
        "lnf_g": jnp.ones((D,), jnp.float32),
        "lnf_b": jnp.zeros((D,), jnp.float32),
        "w_lm": dense(keys[7], (D, V)),
        "b_lm": jnp.zeros((V,), jnp.float32),
    }


# ----------------------------------------------------------------------------
# Forward pass (MultimodalModel.forward ≙ decoder forward -> logits)
# ----------------------------------------------------------------------------
def multimodal_forward(params, pixel_values, input_ids):
    # Patchify NCHW -> [B, NP, C*P*P] (row-major (c, ph, pw) inside a patch).
    x = pixel_values.reshape(B, C, H // P, P, W // P, P)
    x = jnp.transpose(x, (0, 2, 4, 1, 3, 5))
    patches = x.reshape(B, NP, CPP)

    # TODO(synk): token-embedding gather kept in XLA; a DMA-gather via scalar
    # prefetch is not worth it for T=8 rows.
    txt_tok = jnp.take(params["tok_emb"], input_ids, axis=0)      # [B, T, D]

    ln_stack = jnp.stack([params["ln1_g"], params["ln1_b"],
                          params["ln2_g"], params["ln2_b"],
                          params["lnf_g"], params["lnf_b"]], axis=0)   # [6, D]

    shared = lambda b: (0, 0)
    per_batch3 = lambda b: (b, 0, 0)

    logits_padded = pl.pallas_call(
        fused_decoder_kernel,
        out_shape=jax.ShapeDtypeStruct((B, S_PAD, V), jnp.float32),
        grid=(B,),
        in_specs=[
            pl.BlockSpec((None, NP, CPP), per_batch3),    # patches
            pl.BlockSpec((None, T, D), per_batch3),       # text token embeddings
            pl.BlockSpec((S, D), shared),                 # pos_emb
            pl.BlockSpec((6, D), shared),                 # stacked LN params
            pl.BlockSpec((CPP, D), shared),               # w_patch
            pl.BlockSpec((1, D), shared),                 # b_patch
            pl.BlockSpec((D, 3 * D), shared),             # w_qkv
            pl.BlockSpec((1, 3 * D), shared),             # b_qkv
            pl.BlockSpec((D, D), shared),                 # w_o
            pl.BlockSpec((1, D), shared),                 # b_o
            pl.BlockSpec((D, F), shared),                 # w_mlp1
            pl.BlockSpec((1, F), shared),                 # b_mlp1
            pl.BlockSpec((F, D), shared),                 # w_mlp2
            pl.BlockSpec((1, D), shared),                 # b_mlp2
            pl.BlockSpec((D, V), shared),                 # w_lm
            pl.BlockSpec((1, V), shared),                 # b_lm
        ],
        out_specs=pl.BlockSpec((None, S_PAD, V), per_batch3),
        scratch_shapes=[
            pltpu.VMEM((S_PAD, D), jnp.float32),          # residual stream h
            pltpu.VMEM((S_PAD, 3 * D), jnp.float32),      # qkv
            pltpu.VMEM((S_PAD, D), jnp.float32),          # attention output
        ],
        compiler_params=pltpu.CompilerParams(
            dimension_semantics=("parallel",)),           # batch across TCs (v7x)
    )(patches, txt_tok, params["pos_emb"], ln_stack,
      params["w_patch"], params["b_patch"].reshape(1, D),
      params["w_qkv"], params["b_qkv"].reshape(1, 3 * D),
      params["w_o"], params["b_o"].reshape(1, D),
      params["w_mlp1"], params["b_mlp1"].reshape(1, F),
      params["w_mlp2"], params["b_mlp2"].reshape(1, D),
      params["w_lm"], params["b_lm"].reshape(1, V))

    return logits_padded[:, :S, :]                        # drop padded rows


# TODO(synk): generate_caption / tokenizer batch_decode / PEFT plumbing are
# host-side control flow with no Pallas equivalent; only the decoder forward
# (the compute path of MultimodalModel.forward) is implemented here.


if __name__ == "__main__":
    key = jax.random.PRNGKey(0)
    k_param, k_pix, k_ids = jax.random.split(key, 3)

    params = init_params(k_param)
    pixel_values = jax.random.normal(k_pix, (B, C, H, W), dtype=jnp.float32)
    input_ids = jax.random.randint(k_ids, (B, T), 0, V, dtype=jnp.int32)

    logits = jax.jit(multimodal_forward)(params, pixel_values, input_ids)
    logits = jax.block_until_ready(logits)

    assert logits.shape == (B, S, V), logits.shape
    assert jnp.all(jnp.isfinite(logits)), "non-finite logits"
    print("KERNEL_OK")
</pallas_src>

<mosaic_0001>
module attributes {stable_mosaic.version = 11 : i64} {
  func.func @fused_decoder_kernel(%arg0: i32, %arg1: memref<1x4x192xf32, #tpu.memory_space<vmem>>, %arg2: memref<1x8x128xf32, #tpu.memory_space<vmem>>, %arg3: memref<12x128xf32, #tpu.memory_space<vmem>>, %arg4: memref<6x128xf32, #tpu.memory_space<vmem>>, %arg5: memref<192x128xbf16, #tpu.memory_space<vmem>>, %arg6: memref<1x128xf32, #tpu.memory_space<vmem>>, %arg7: memref<128x384xbf16, #tpu.memory_space<vmem>>, %arg8: memref<1x384xf32, #tpu.memory_space<vmem>>, %arg9: memref<128x128xbf16, #tpu.memory_space<vmem>>, %arg10: memref<1x128xf32, #tpu.memory_space<vmem>>, %arg11: memref<128x256xbf16, #tpu.memory_space<vmem>>, %arg12: memref<1x256xf32, #tpu.memory_space<vmem>>, %arg13: memref<256x128xbf16, #tpu.memory_space<vmem>>, %arg14: memref<1x128xf32, #tpu.memory_space<vmem>>, %arg15: memref<128x256xbf16, #tpu.memory_space<vmem>>, %arg16: memref<1x256xf32, #tpu.memory_space<vmem>>, %arg17: memref<1x16x256xf32, #tpu.memory_space<vmem>>, %arg18: memref<16x128xf32, #tpu.memory_space<vmem>>, %arg19: memref<16x384xf32, #tpu.memory_space<vmem>>, %arg20: memref<16x128xf32, #tpu.memory_space<vmem>>) attributes {dimension_semantics = [#tpu.dimension_semantics<parallel>], iteration_bounds = array<i64: 2>, scalar_prefetch = 0 : i64, scratch_operands = 3 : i64, tpu.core_type = #tpu.core_type<tc>, window_params = [{transform_indices = @transform_0, window_bounds = array<i64: 1, 4, 192>}, {transform_indices = @transform_1, window_bounds = array<i64: 1, 8, 128>}, {pipeline_mode = #tpu.pipeline_mode<synchronous>, transform_indices = @transform_2, window_bounds = array<i64: 12, 128>}, {pipeline_mode = #tpu.pipeline_mode<synchronous>, transform_indices = @transform_3, window_bounds = array<i64: 6, 128>}, {pipeline_mode = #tpu.pipeline_mode<synchronous>, transform_indices = @transform_4, window_bounds = array<i64: 192, 128>}, {pipeline_mode = #tpu.pipeline_mode<synchronous>, transform_indices = @transform_5, window_bounds = array<i64: 1, 128>}, {pipeline_mode = #tpu.pipeline_mode<synchronous>, transform_indices = @transform_6, window_bounds = array<i64: 128, 384>}, {pipeline_mode = #tpu.pipeline_mode<synchronous>, transform_indices = @transform_7, window_bounds = array<i64: 1, 384>}, {pipeline_mode = #tpu.pipeline_mode<synchronous>, transform_indices = @transform_8, window_bounds = array<i64: 128, 128>}, {pipeline_mode = #tpu.pipeline_mode<synchronous>, transform_indices = @transform_9, window_bounds = array<i64: 1, 128>}, {pipeline_mode = #tpu.pipeline_mode<synchronous>, transform_indices = @transform_10, window_bounds = array<i64: 128, 256>}, {pipeline_mode = #tpu.pipeline_mode<synchronous>, transform_indices = @transform_11, window_bounds = array<i64: 1, 256>}, {pipeline_mode = #tpu.pipeline_mode<synchronous>, transform_indices = @transform_12, window_bounds = array<i64: 256, 128>}, {pipeline_mode = #tpu.pipeline_mode<synchronous>, transform_indices = @transform_13, window_bounds = array<i64: 1, 128>}, {pipeline_mode = #tpu.pipeline_mode<synchronous>, transform_indices = @transform_14, window_bounds = array<i64: 128, 256>}, {pipeline_mode = #tpu.pipeline_mode<synchronous>, transform_indices = @transform_15, window_bounds = array<i64: 1, 256>}, {transform_indices = @transform_16, window_bounds = array<i64: 1, 16, 256>}]} {
    %c0 = arith.constant 0 : index
    %c0_0 = arith.constant 0 : index
    %0 = vector.load %arg4[%c0, %c0_0] : memref<6x128xf32, #tpu.memory_space<vmem>>, vector<6x128xf32>
    %c0_1 = arith.constant 0 : index
    %c0_2 = arith.constant 0 : index
    %c0_3 = arith.constant 0 : index
    %1 = vector.load %arg1[%c0_1, %c0_2, %c0_3] : memref<1x4x192xf32, #tpu.memory_space<vmem>>, vector<1x4x192xf32>
    %2 = vector.shape_cast %1 : vector<1x4x192xf32> to vector<4x192xf32>
    %3 = arith.truncf %2 : vector<4x192xf32> to vector<4x192xbf16>
    %c0_4 = arith.constant 0 : index
    %c0_5 = arith.constant 0 : index
    %4 = vector.load %arg5[%c0_4, %c0_5] : memref<192x128xbf16, #tpu.memory_space<vmem>>, vector<192x128xbf16>
    %cst = arith.constant dense<0.000000e+00> : vector<4x128xf32>
    %5 = tpu.matmul %3, %4, %cst {dimension_numbers = #tpu.dot_dimension_numbers<[1], [0], [0], [1], [0, 0, 1, 1], [], []>} : vector<4x192xbf16>, vector<192x128xbf16>, vector<4x128xf32> -> vector<4x128xf32>
    %c0_6 = arith.constant 0 : index
    %c0_7 = arith.constant 0 : index
    %6 = vector.load %arg6[%c0_6, %c0_7] : memref<1x128xf32, #tpu.memory_space<vmem>>, vector<1x128xf32>
    %7 = vector.broadcast %6 : vector<1x128xf32> to vector<4x128xf32>
    %8 = arith.addf %5, %7 : vector<4x128xf32>
    %c0_8 = arith.constant 0 : index
    %c0_9 = arith.constant 0 : index
    %9 = vector.load %arg3[%c0_8, %c0_9] : memref<12x128xf32, #tpu.memory_space<vmem>>, vector<4x128xf32>
    %10 = arith.addf %8, %9 : vector<4x128xf32>
    %c0_10 = arith.constant 0 : index
    %c0_11 = arith.constant 0 : index
    %11 = vector.load %arg18[%c0_10, %c0_11] : memref<16x128xf32, #tpu.memory_space<vmem>>, vector<4x128xf32>
    tpu.vector_store %arg18[%c0_10, %c0_11], %10 {strides = array<i32>} : memref<16x128xf32, #tpu.memory_space<vmem>>, vector<4x128xf32>,
    %c0_12 = arith.constant 0 : index
    %c0_13 = arith.constant 0 : index
    %c0_14 = arith.constant 0 : index
    %12 = vector.load %arg2[%c0_12, %c0_13, %c0_14] : memref<1x8x128xf32, #tpu.memory_space<vmem>>, vector<1x8x128xf32>
    %13 = vector.shape_cast %12 : vector<1x8x128xf32> to vector<8x128xf32>
    %c4 = arith.constant 4 : index
    %c0_15 = arith.constant 0 : index
    %14 = vector.load %arg3[%c4, %c0_15] : memref<12x128xf32, #tpu.memory_space<vmem>>, vector<8x128xf32>
    %15 = arith.addf %13, %14 : vector<8x128xf32>
    %c4_16 = arith.constant 4 : index
    %c0_17 = arith.constant 0 : index
    %16 = vector.load %arg18[%c4_16, %c0_17] : memref<16x128xf32, #tpu.memory_space<vmem>>, vector<8x128xf32>
    tpu.vector_store %arg18[%c4_16, %c0_17], %15 {strides = array<i32>} : memref<16x128xf32, #tpu.memory_space<vmem>>, vector<8x128xf32>,
    %cst_18 = arith.constant 0.000000e+00 : f32
    %17 = vector.broadcast %cst_18 : f32 to vector<4x128xf32>
    %c12 = arith.constant 12 : index
    %c0_19 = arith.constant 0 : index
    %18 = vector.load %arg18[%c12, %c0_19] : memref<16x128xf32, #tpu.memory_space<vmem>>, vector<4x128xf32>
    tpu.vector_store %arg18[%c12, %c0_19], %17 {strides = array<i32>} : memref<16x128xf32, #tpu.memory_space<vmem>>, vector<4x128xf32>,
    %c0_20 = arith.constant 0 : index
    %c0_21 = arith.constant 0 : index
    %19 = vector.load %arg18[%c0_20, %c0_21] : memref<16x128xf32, #tpu.memory_space<vmem>>, vector<16x128xf32>
    %20 = vector.extract_strided_slice %0 {offsets = [0, 0], sizes = [1, 128], strides = [1, 1]} : vector<6x128xf32> to vector<1x128xf32>
    %21 = vector.extract_strided_slice %0 {offsets = [1, 0], sizes = [1, 128], strides = [1, 1]} : vector<6x128xf32> to vector<1x128xf32>
    %cst_22 = arith.constant dense<0.000000e+00> : vector<16xf32>
    %22 = vector.multi_reduction <add>, %19, %cst_22 [1] : vector<16x128xf32> to vector<16xf32>
    %23 = vector.shape_cast %22 : vector<16xf32> to vector<16x1xf32>
    %cst_23 = arith.constant 1.280000e+02 : f32
    %24 = vector.broadcast %cst_23 : f32 to vector<16x1xf32>
    %25 = arith.divf %23, %24 : vector<16x1xf32>
    %26 = vector.broadcast %25 : vector<16x1xf32> to vector<16x128xf32>
    %27 = arith.subf %19, %26 : vector<16x128xf32>
    %28 = arith.mulf %27, %27 : vector<16x128xf32>
    %cst_24 = arith.constant dense<0.000000e+00> : vector<16xf32>
    %29 = vector.multi_reduction <add>, %28, %cst_24 [1] : vector<16x128xf32> to vector<16xf32>
    %30 = vector.shape_cast %29 : vector<16xf32> to vector<16x1xf32>
    %cst_25 = arith.constant 1.280000e+02 : f32
    %31 = vector.broadcast %cst_25 : f32 to vector<16x1xf32>
    %32 = arith.divf %30, %31 : vector<16x1xf32>
    %33 = vector.broadcast %25 : vector<16x1xf32> to vector<16x128xf32>
    %34 = arith.subf %19, %33 : vector<16x128xf32>
    %cst_26 = arith.constant 9.99999974E-6 : f32
    %35 = vector.broadcast %cst_26 : f32 to vector<16x1xf32>
    %36 = arith.addf %32, %35 : vector<16x1xf32>
    %37 = math.rsqrt %36 : vector<16x1xf32>
    %38 = vector.broadcast %37 : vector<16x1xf32> to vector<16x128xf32>
    %39 = arith.mulf %34, %38 : vector<16x128xf32>
    %40 = vector.broadcast %20 : vector<1x128xf32> to vector<16x128xf32>
    %41 = arith.mulf %39, %40 : vector<16x128xf32>
    %42 = vector.broadcast %21 : vector<1x128xf32> to vector<16x128xf32>
    %43 = arith.addf %41, %42 : vector<16x128xf32>
    %44 = arith.truncf %43 : vector<16x128xf32> to vector<16x128xbf16>
    %c0_27 = arith.constant 0 : index
    %c0_28 = arith.constant 0 : index
    %45 = vector.load %arg7[%c0_27, %c0_28] : memref<128x384xbf16, #tpu.memory_space<vmem>>, vector<128x384xbf16>
    %cst_29 = arith.constant dense<0.000000e+00> : vector<16x384xf32>
    %46 = tpu.matmul %44, %45, %cst_29 {dimension_numbers = #tpu.dot_dimension_numbers<[1], [0], [0], [1], [0, 0, 1, 1], [], []>} : vector<16x128xbf16>, vector<128x384xbf16>, vector<16x384xf32> -> vector<16x384xf32>
    %c0_30 = arith.constant 0 : index
    %c0_31 = arith.constant 0 : index
    %47 = vector.load %arg8[%c0_30, %c0_31] : memref<1x384xf32, #tpu.memory_space<vmem>>, vector<1x384xf32>
    %48 = vector.broadcast %47 : vector<1x384xf32> to vector<16x384xf32>
    %49 = arith.addf %46, %48 : vector<16x384xf32>
    %c0_32 = arith.constant 0 : index
    %c0_33 = arith.constant 0 : index
    %50 = vector.load %arg19[%c0_32, %c0_33] : memref<16x384xf32, #tpu.memory_space<vmem>>, vector<16x384xf32>
    tpu.vector_store %arg19[%c0_32, %c0_33], %49 {strides = array<i32>} : memref<16x384xf32, #tpu.memory_space<vmem>>, vector<16x384xf32>,
    %51 = tpu.iota {dimensions = array<i32: 0>} : vector<16x16xi32>
    %52 = tpu.iota {dimensions = array<i32: 1>} : vector<16x16xi32>
    %53 = arith.cmpi sle, %52, %51 : vector<16x16xi32>
    %cst_34 = arith.constant 0.000000e+00 : f32
    %cst_35 = arith.constant -1.000000e+30 : f32
    %54 = vector.broadcast %cst_34 : f32 to vector<16x16xf32>
    %55 = vector.broadcast %cst_35 : f32 to vector<16x16xf32>
    %56 = arith.select %53, %54, %55 : vector<16x16xi1>, vector<16x16xf32>
    %c0_36 = arith.constant 0 : index
    %c0_37 = arith.constant 0 : index
    %57 = vector.load %arg19[%c0_36, %c0_37] : memref<16x384xf32, #tpu.memory_space<vmem>>, vector<16x32xf32>
    %c0_38 = arith.constant 0 : index
    %c128 = arith.constant 128 : index
    %58 = vector.load %arg19[%c0_38, %c128] : memref<16x384xf32, #tpu.memory_space<vmem>>, vector<16x32xf32>
    %c0_39 = arith.constant 0 : index
    %c256 = arith.constant 256 : index
    %59 = vector.load %arg19[%c0_39, %c256] : memref<16x384xf32, #tpu.memory_space<vmem>>, vector<16x32xf32>
    %60 = arith.truncf %57 : vector<16x32xf32> to vector<16x32xbf16>
    %61 = arith.truncf %58 : vector<16x32xf32> to vector<16x32xbf16>
    %cst_40 = arith.constant dense<0.000000e+00> : vector<16x16xf32>
    %62 = tpu.matmul %60, %61, %cst_40 {dimension_numbers = #tpu.dot_dimension_numbers<[1], [1], [0], [0], [0, 0, 1, 0], [], []>} : vector<16x32xbf16>, vector<16x32xbf16>, vector<16x16xf32> -> vector<16x16xf32>
    %cst_41 = arith.constant 0.176776692 : f32
    %63 = vector.broadcast %cst_41 : f32 to vector<16x16xf32>
    %64 = arith.mulf %62, %63 : vector<16x16xf32>
    %65 = arith.addf %64, %56 : vector<16x16xf32>
    %cst_42 = arith.constant dense<0xFF800000> : vector<16xf32>
    %66 = vector.multi_reduction <maximumf>, %65, %cst_42 [1] : vector<16x16xf32> to vector<16xf32>
    %67 = vector.shape_cast %66 : vector<16xf32> to vector<16x1xf32>
    %68 = vector.broadcast %67 : vector<16x1xf32> to vector<16x16xf32>
    %69 = arith.subf %65, %68 : vector<16x16xf32>
    %70 = math.exp %69 : vector<16x16xf32>
    %cst_43 = arith.constant dense<0.000000e+00> : vector<16xf32>
    %71 = vector.multi_reduction <add>, %70, %cst_43 [1] : vector<16x16xf32> to vector<16xf32>
    %72 = vector.shape_cast %71 : vector<16xf32> to vector<16x1xf32>
    %73 = arith.truncf %70 : vector<16x16xf32> to vector<16x16xbf16>
    %74 = arith.truncf %59 : vector<16x32xf32> to vector<16x32xbf16>
    %cst_44 = arith.constant dense<0.000000e+00> : vector<16x32xf32>
    %75 = tpu.matmul %73, %74, %cst_44 {dimension_numbers = #tpu.dot_dimension_numbers<[1], [0], [0], [1], [0, 0, 1, 1], [], []>} : vector<16x16xbf16>, vector<16x32xbf16>, vector<16x32xf32> -> vector<16x32xf32>
    %76 = tpu.reciprocal %72 {approx = true} : vector<16x1xf32> -> vector<16x1xf32>
    %77 = vector.broadcast %76 : vector<16x1xf32> to vector<16x32xf32>
    %78 = arith.mulf %75, %77 : vector<16x32xf32>
    %c0_45 = arith.constant 0 : index
    %c0_46 = arith.constant 0 : index
    %79 = vector.load %arg20[%c0_45, %c0_46] : memref<16x128xf32, #tpu.memory_space<vmem>>, vector<16x32xf32>
    tpu.vector_store %arg20[%c0_45, %c0_46], %78 {strides = array<i32>} : memref<16x128xf32, #tpu.memory_space<vmem>>, vector<16x32xf32>,
    %c0_47 = arith.constant 0 : index
    %c32 = arith.constant 32 : index
    %80 = vector.load %arg19[%c0_47, %c32] : memref<16x384xf32, #tpu.memory_space<vmem>>, vector<16x32xf32>
    %c0_48 = arith.constant 0 : index
    %c160 = arith.constant 160 : index
    %81 = vector.load %arg19[%c0_48, %c160] : memref<16x384xf32, #tpu.memory_space<vmem>>, vector<16x32xf32>
    %c0_49 = arith.constant 0 : index
    %c288 = arith.constant 288 : index
    %82 = vector.load %arg19[%c0_49, %c288] : memref<16x384xf32, #tpu.memory_space<vmem>>, vector<16x32xf32>
    %83 = arith.truncf %80 : vector<16x32xf32> to vector<16x32xbf16>
    %84 = arith.truncf %81 : vector<16x32xf32> to vector<16x32xbf16>
    %cst_50 = arith.constant dense<0.000000e+00> : vector<16x16xf32>
    %85 = tpu.matmul %83, %84, %cst_50 {dimension_numbers = #tpu.dot_dimension_numbers<[1], [1], [0], [0], [0, 0, 1, 0], [], []>} : vector<16x32xbf16>, vector<16x32xbf16>, vector<16x16xf32> -> vector<16x16xf32>
    %cst_51 = arith.constant 0.176776692 : f32
    %86 = vector.broadcast %cst_51 : f32 to vector<16x16xf32>
    %87 = arith.mulf %85, %86 : vector<16x16xf32>
    %88 = arith.addf %87, %56 : vector<16x16xf32>
    %cst_52 = arith.constant dense<0xFF800000> : vector<16xf32>
    %89 = vector.multi_reduction <maximumf>, %88, %cst_52 [1] : vector<16x16xf32> to vector<16xf32>
    %90 = vector.shape_cast %89 : vector<16xf32> to vector<16x1xf32>
    %91 = vector.broadcast %90 : vector<16x1xf32> to vector<16x16xf32>
    %92 = arith.subf %88, %91 : vector<16x16xf32>
    %93 = math.exp %92 : vector<16x16xf32>
    %cst_53 = arith.constant dense<0.000000e+00> : vector<16xf32>
    %94 = vector.multi_reduction <add>, %93, %cst_53 [1] : vector<16x16xf32> to vector<16xf32>
    %95 = vector.shape_cast %94 : vector<16xf32> to vector<16x1xf32>
    %96 = arith.truncf %93 : vector<16x16xf32> to vector<16x16xbf16>
    %97 = arith.truncf %82 : vector<16x32xf32> to vector<16x32xbf16>
    %cst_54 = arith.constant dense<0.000000e+00> : vector<16x32xf32>
    %98 = tpu.matmul %96, %97, %cst_54 {dimension_numbers = #tpu.dot_dimension_numbers<[1], [0], [0], [1], [0, 0, 1, 1], [], []>} : vector<16x16xbf16>, vector<16x32xbf16>, vector<16x32xf32> -> vector<16x32xf32>
    %99 = tpu.reciprocal %95 {approx = true} : vector<16x1xf32> -> vector<16x1xf32>
    %100 = vector.broadcast %99 : vector<16x1xf32> to vector<16x32xf32>
    %101 = arith.mulf %98, %100 : vector<16x32xf32>
    %c0_55 = arith.constant 0 : index
    %c32_56 = arith.constant 32 : index
    %102 = vector.load %arg20[%c0_55, %c32_56] : memref<16x128xf32, #tpu.memory_space<vmem>>, vector<16x32xf32>
    tpu.vector_store %arg20[%c0_55, %c32_56], %101 {strides = array<i32>} : memref<16x128xf32, #tpu.memory_space<vmem>>, vector<16x32xf32>,
    %c0_57 = arith.constant 0 : index
    %c64 = arith.constant 64 : index
    %103 = vector.load %arg19[%c0_57, %c64] : memref<16x384xf32, #tpu.memory_space<vmem>>, vector<16x32xf32>
    %c0_58 = arith.constant 0 : index
    %c192 = arith.constant 192 : index
    %104 = vector.load %arg19[%c0_58, %c192] : memref<16x384xf32, #tpu.memory_space<vmem>>, vector<16x32xf32>
    %c0_59 = arith.constant 0 : index
    %c320 = arith.constant 320 : index
    %105 = vector.load %arg19[%c0_59, %c320] : memref<16x384xf32, #tpu.memory_space<vmem>>, vector<16x32xf32>
    %106 = arith.truncf %103 : vector<16x32xf32> to vector<16x32xbf16>
    %107 = arith.truncf %104 : vector<16x32xf32> to vector<16x32xbf16>
    %cst_60 = arith.constant dense<0.000000e+00> : vector<16x16xf32>
    %108 = tpu.matmul %106, %107, %cst_60 {dimension_numbers = #tpu.dot_dimension_numbers<[1], [1], [0], [0], [0, 0, 1, 0], [], []>} : vector<16x32xbf16>, vector<16x32xbf16>, vector<16x16xf32> -> vector<16x16xf32>
    %cst_61 = arith.constant 0.176776692 : f32
    %109 = vector.broadcast %cst_61 : f32 to vector<16x16xf32>
    %110 = arith.mulf %108, %109 : vector<16x16xf32>
    %111 = arith.addf %110, %56 : vector<16x16xf32>
    %cst_62 = arith.constant dense<0xFF800000> : vector<16xf32>
    %112 = vector.multi_reduction <maximumf>, %111, %cst_62 [1] : vector<16x16xf32> to vector<16xf32>
    %113 = vector.shape_cast %112 : vector<16xf32> to vector<16x1xf32>
    %114 = vector.broadcast %113 : vector<16x1xf32> to vector<16x16xf32>
    %115 = arith.subf %111, %114 : vector<16x16xf32>
    %116 = math.exp %115 : vector<16x16xf32>
    %cst_63 = arith.constant dense<0.000000e+00> : vector<16xf32>
    %117 = vector.multi_reduction <add>, %116, %cst_63 [1] : vector<16x16xf32> to vector<16xf32>
    %118 = vector.shape_cast %117 : vector<16xf32> to vector<16x1xf32>
    %119 = arith.truncf %116 : vector<16x16xf32> to vector<16x16xbf16>
    %120 = arith.truncf %105 : vector<16x32xf32> to vector<16x32xbf16>
    %cst_64 = arith.constant dense<0.000000e+00> : vector<16x32xf32>
    %121 = tpu.matmul %119, %120, %cst_64 {dimension_numbers = #tpu.dot_dimension_numbers<[1], [0], [0], [1], [0, 0, 1, 1], [], []>} : vector<16x16xbf16>, vector<16x32xbf16>, vector<16x32xf32> -> vector<16x32xf32>
    %122 = tpu.reciprocal %118 {approx = true} : vector<16x1xf32> -> vector<16x1xf32>
    %123 = vector.broadcast %122 : vector<16x1xf32> to vector<16x32xf32>
    %124 = arith.mulf %121, %123 : vector<16x32xf32>
    %c0_65 = arith.constant 0 : index
    %c64_66 = arith.constant 64 : index
    %125 = vector.load %arg20[%c0_65, %c64_66] : memref<16x128xf32, #tpu.memory_space<vmem>>, vector<16x32xf32>
    tpu.vector_store %arg20[%c0_65, %c64_66], %124 {strides = array<i32>} : memref<16x128xf32, #tpu.memory_space<vmem>>, vector<16x32xf32>,
    %c0_67 = arith.constant 0 : index
    %c96 = arith.constant 96 : index
    %126 = vector.load %arg19[%c0_67, %c96] : memref<16x384xf32, #tpu.memory_space<vmem>>, vector<16x32xf32>
    %c0_68 = arith.constant 0 : index
    %c224 = arith.constant 224 : index
    %127 = vector.load %arg19[%c0_68, %c224] : memref<16x384xf32, #tpu.memory_space<vmem>>, vector<16x32xf32>
    %c0_69 = arith.constant 0 : index
    %c352 = arith.constant 352 : index
    %128 = vector.load %arg19[%c0_69, %c352] : memref<16x384xf32, #tpu.memory_space<vmem>>, vector<16x32xf32>
    %129 = arith.truncf %126 : vector<16x32xf32> to vector<16x32xbf16>
    %130 = arith.truncf %127 : vector<16x32xf32> to vector<16x32xbf16>
    %cst_70 = arith.constant dense<0.000000e+00> : vector<16x16xf32>
    %131 = tpu.matmul %129, %130, %cst_70 {dimension_numbers = #tpu.dot_dimension_numbers<[1], [1], [0], [0], [0, 0, 1, 0], [], []>} : vector<16x32xbf16>, vector<16x32xbf16>, vector<16x16xf32> -> vector<16x16xf32>
    %cst_71 = arith.constant 0.176776692 : f32
    %132 = vector.broadcast %cst_71 : f32 to vector<16x16xf32>
    %133 = arith.mulf %131, %132 : vector<16x16xf32>
    %134 = arith.addf %133, %56 : vector<16x16xf32>
    %cst_72 = arith.constant dense<0xFF800000> : vector<16xf32>
    %135 = vector.multi_reduction <maximumf>, %134, %cst_72 [1] : vector<16x16xf32> to vector<16xf32>
    %136 = vector.shape_cast %135 : vector<16xf32> to vector<16x1xf32>
    %137 = vector.broadcast %136 : vector<16x1xf32> to vector<16x16xf32>
    %138 = arith.subf %134, %137 : vector<16x16xf32>
    %139 = math.exp %138 : vector<16x16xf32>
    %cst_73 = arith.constant dense<0.000000e+00> : vector<16xf32>
    %140 = vector.multi_reduction <add>, %139, %cst_73 [1] : vector<16x16xf32> to vector<16xf32>
    %141 = vector.shape_cast %140 : vector<16xf32> to vector<16x1xf32>
    %142 = arith.truncf %139 : vector<16x16xf32> to vector<16x16xbf16>
    %143 = arith.truncf %128 : vector<16x32xf32> to vector<16x32xbf16>
    %cst_74 = arith.constant dense<0.000000e+00> : vector<16x32xf32>
    %144 = tpu.matmul %142, %143, %cst_74 {dimension_numbers = #tpu.dot_dimension_numbers<[1], [0], [0], [1], [0, 0, 1, 1], [], []>} : vector<16x16xbf16>, vector<16x32xbf16>, vector<16x32xf32> -> vector<16x32xf32>
    %145 = tpu.reciprocal %141 {approx = true} : vector<16x1xf32> -> vector<16x1xf32>
    %146 = vector.broadcast %145 : vector<16x1xf32> to vector<16x32xf32>
    %147 = arith.mulf %144, %146 : vector<16x32xf32>
    %c0_75 = arith.constant 0 : index
    %c96_76 = arith.constant 96 : index
    %148 = vector.load %arg20[%c0_75, %c96_76] : memref<16x128xf32, #tpu.memory_space<vmem>>, vector<16x32xf32>
    tpu.vector_store %arg20[%c0_75, %c96_76], %147 {strides = array<i32>} : memref<16x128xf32, #tpu.memory_space<vmem>>, vector<16x32xf32>,
    %c0_77 = arith.constant 0 : index
    %c0_78 = arith.constant 0 : index
    %149 = vector.load %arg20[%c0_77, %c0_78] : memref<16x128xf32, #tpu.memory_space<vmem>>, vector<16x128xf32>
    %150 = arith.truncf %149 : vector<16x128xf32> to vector<16x128xbf16>
    %c0_79 = arith.constant 0 : index
    %c0_80 = arith.constant 0 : index
    %151 = vector.load %arg9[%c0_79, %c0_80] : memref<128x128xbf16, #tpu.memory_space<vmem>>, vector<128x128xbf16>
    %cst_81 = arith.constant dense<0.000000e+00> : vector<16x128xf32>
    %152 = tpu.matmul %150, %151, %cst_81 {dimension_numbers = #tpu.dot_dimension_numbers<[1], [0], [0], [1], [0, 0, 1, 1], [], []>} : vector<16x128xbf16>, vector<128x128xbf16>, vector<16x128xf32> -> vector<16x128xf32>
    %c0_82 = arith.constant 0 : index
    %c0_83 = arith.constant 0 : index
    %153 = vector.load %arg10[%c0_82, %c0_83] : memref<1x128xf32, #tpu.memory_space<vmem>>, vector<1x128xf32>
    %154 = vector.broadcast %153 : vector<1x128xf32> to vector<16x128xf32>
    %155 = arith.addf %152, %154 : vector<16x128xf32>
    %156 = arith.addf %19, %155 : vector<16x128xf32>
    %157 = vector.extract_strided_slice %0 {offsets = [2, 0], sizes = [1, 128], strides = [1, 1]} : vector<6x128xf32> to vector<1x128xf32>
    %158 = vector.extract_strided_slice %0 {offsets = [3, 0], sizes = [1, 128], strides = [1, 1]} : vector<6x128xf32> to vector<1x128xf32>
    %cst_84 = arith.constant dense<0.000000e+00> : vector<16xf32>
    %159 = vector.multi_reduction <add>, %156, %cst_84 [1] : vector<16x128xf32> to vector<16xf32>
    %160 = vector.shape_cast %159 : vector<16xf32> to vector<16x1xf32>
    %cst_85 = arith.constant 1.280000e+02 : f32
    %161 = vector.broadcast %cst_85 : f32 to vector<16x1xf32>
    %162 = arith.divf %160, %161 : vector<16x1xf32>
    %163 = vector.broadcast %162 : vector<16x1xf32> to vector<16x128xf32>
    %164 = arith.subf %156, %163 : vector<16x128xf32>
    %165 = arith.mulf %164, %164 : vector<16x128xf32>
    %cst_86 = arith.constant dense<0.000000e+00> : vector<16xf32>
    %166 = vector.multi_reduction <add>, %165, %cst_86 [1] : vector<16x128xf32> to vector<16xf32>
    %167 = vector.shape_cast %166 : vector<16xf32> to vector<16x1xf32>
    %cst_87 = arith.constant 1.280000e+02 : f32
    %168 = vector.broadcast %cst_87 : f32 to vector<16x1xf32>
    %169 = arith.divf %167, %168 : vector<16x1xf32>
    %170 = vector.broadcast %162 : vector<16x1xf32> to vector<16x128xf32>
    %171 = arith.subf %156, %170 : vector<16x128xf32>
    %cst_88 = arith.constant 9.99999974E-6 : f32
    %172 = vector.broadcast %cst_88 : f32 to vector<16x1xf32>
    %173 = arith.addf %169, %172 : vector<16x1xf32>
    %174 = math.rsqrt %173 : vector<16x1xf32>
    %175 = vector.broadcast %174 : vector<16x1xf32> to vector<16x128xf32>
    %176 = arith.mulf %171, %175 : vector<16x128xf32>
    %177 = vector.broadcast %157 : vector<1x128xf32> to vector<16x128xf32>
    %178 = arith.mulf %176, %177 : vector<16x128xf32>
    %179 = vector.broadcast %158 : vector<1x128xf32> to vector<16x128xf32>
    %180 = arith.addf %178, %179 : vector<16x128xf32>
    %181 = arith.truncf %180 : vector<16x128xf32> to vector<16x128xbf16>
    %c0_89 = arith.constant 0 : index
    %c0_90 = arith.constant 0 : index
    %182 = vector.load %arg11[%c0_89, %c0_90] : memref<128x256xbf16, #tpu.memory_space<vmem>>, vector<128x256xbf16>
    %cst_91 = arith.constant dense<0.000000e+00> : vector<16x256xf32>
    %183 = tpu.matmul %181, %182, %cst_91 {dimension_numbers = #tpu.dot_dimension_numbers<[1], [0], [0], [1], [0, 0, 1, 1], [], []>} : vector<16x128xbf16>, vector<128x256xbf16>, vector<16x256xf32> -> vector<16x256xf32>
    %c0_92 = arith.constant 0 : index
    %c0_93 = arith.constant 0 : index
    %184 = vector.load %arg12[%c0_92, %c0_93] : memref<1x256xf32, #tpu.memory_space<vmem>>, vector<1x256xf32>
    %185 = vector.broadcast %184 : vector<1x256xf32> to vector<16x256xf32>
    %186 = arith.addf %183, %185 : vector<16x256xf32>
    %187 = arith.mulf %186, %186 : vector<16x256xf32>
    %188 = arith.mulf %186, %187 : vector<16x256xf32>
    %cst_94 = arith.constant 4.471500e-02 : f32
    %189 = vector.broadcast %cst_94 : f32 to vector<16x256xf32>
    %190 = arith.mulf %189, %188 : vector<16x256xf32>
    %191 = arith.addf %186, %190 : vector<16x256xf32>
    %cst_95 = arith.constant 0.797884583 : f32
    %192 = vector.broadcast %cst_95 : f32 to vector<16x256xf32>
    %193 = arith.mulf %192, %191 : vector<16x256xf32>
    %194 = math.tanh %193 : vector<16x256xf32>
    %cst_96 = arith.constant 1.000000e+00 : f32
    %195 = vector.broadcast %cst_96 : f32 to vector<16x256xf32>
    %196 = arith.addf %195, %194 : vector<16x256xf32>
    %cst_97 = arith.constant 5.000000e-01 : f32
    %197 = vector.broadcast %cst_97 : f32 to vector<16x256xf32>
    %198 = arith.mulf %197, %196 : vector<16x256xf32>
    %199 = arith.mulf %186, %198 : vector<16x256xf32>
    %200 = arith.truncf %199 : vector<16x256xf32> to vector<16x256xbf16>
    %c0_98 = arith.constant 0 : index
    %c0_99 = arith.constant 0 : index
    %201 = vector.load %arg13[%c0_98, %c0_99] : memref<256x128xbf16, #tpu.memory_space<vmem>>, vector<256x128xbf16>
    %cst_100 = arith.constant dense<0.000000e+00> : vector<16x128xf32>
    %202 = tpu.matmul %200, %201, %cst_100 {dimension_numbers = #tpu.dot_dimension_numbers<[1], [0], [0], [1], [0, 0, 1, 1], [], []>} : vector<16x256xbf16>, vector<256x128xbf16>, vector<16x128xf32> -> vector<16x128xf32>
    %c0_101 = arith.constant 0 : index
    %c0_102 = arith.constant 0 : index
    %203 = vector.load %arg14[%c0_101, %c0_102] : memref<1x128xf32, #tpu.memory_space<vmem>>, vector<1x128xf32>
    %204 = vector.broadcast %203 : vector<1x128xf32> to vector<16x128xf32>
    %205 = arith.addf %202, %204 : vector<16x128xf32>
    %206 = arith.addf %156, %205 : vector<16x128xf32>
    %207 = vector.extract_strided_slice %0 {offsets = [4, 0], sizes = [1, 128], strides = [1, 1]} : vector<6x128xf32> to vector<1x128xf32>
    %208 = vector.extract_strided_slice %0 {offsets = [5, 0], sizes = [1, 128], strides = [1, 1]} : vector<6x128xf32> to vector<1x128xf32>
    %cst_103 = arith.constant dense<0.000000e+00> : vector<16xf32>
    %209 = vector.multi_reduction <add>, %206, %cst_103 [1] : vector<16x128xf32> to vector<16xf32>
    %210 = vector.shape_cast %209 : vector<16xf32> to vector<16x1xf32>
    %cst_104 = arith.constant 1.280000e+02 : f32
    %211 = vector.broadcast %cst_104 : f32 to vector<16x1xf32>
    %212 = arith.divf %210, %211 : vector<16x1xf32>
    %213 = vector.broadcast %212 : vector<16x1xf32> to vector<16x128xf32>
    %214 = arith.subf %206, %213 : vector<16x128xf32>
    %215 = arith.mulf %214, %214 : vector<16x128xf32>
    %cst_105 = arith.constant dense<0.000000e+00> : vector<16xf32>
    %216 = vector.multi_reduction <add>, %215, %cst_105 [1] : vector<16x128xf32> to vector<16xf32>
    %217 = vector.shape_cast %216 : vector<16xf32> to vector<16x1xf32>
    %cst_106 = arith.constant 1.280000e+02 : f32
    %218 = vector.broadcast %cst_106 : f32 to vector<16x1xf32>
    %219 = arith.divf %217, %218 : vector<16x1xf32>
    %220 = vector.broadcast %212 : vector<16x1xf32> to vector<16x128xf32>
    %221 = arith.subf %206, %220 : vector<16x128xf32>
    %cst_107 = arith.constant 9.99999974E-6 : f32
    %222 = vector.broadcast %cst_107 : f32 to vector<16x1xf32>
    %223 = arith.addf %219, %222 : vector<16x1xf32>
    %224 = math.rsqrt %223 : vector<16x1xf32>
    %225 = vector.broadcast %224 : vector<16x1xf32> to vector<16x128xf32>
    %226 = arith.mulf %221, %225 : vector<16x128xf32>
    %227 = vector.broadcast %207 : vector<1x128xf32> to vector<16x128xf32>
    %228 = arith.mulf %226, %227 : vector<16x128xf32>
    %229 = vector.broadcast %208 : vector<1x128xf32> to vector<16x128xf32>
    %230 = arith.addf %228, %229 : vector<16x128xf32>
    %231 = arith.truncf %230 : vector<16x128xf32> to vector<16x128xbf16>
    %c0_108 = arith.constant 0 : index
    %c0_109 = arith.constant 0 : index
    %232 = vector.load %arg15[%c0_108, %c0_109] : memref<128x256xbf16, #tpu.memory_space<vmem>>, vector<128x256xbf16>
    %cst_110 = arith.constant dense<0.000000e+00> : vector<16x256xf32>
    %233 = tpu.matmul %231, %232, %cst_110 {dimension_numbers = #tpu.dot_dimension_numbers<[1], [0], [0], [1], [0, 0, 1, 1], [], []>} : vector<16x128xbf16>, vector<128x256xbf16>, vector<16x256xf32> -> vector<16x256xf32>
    %c0_111 = arith.constant 0 : index
    %c0_112 = arith.constant 0 : index
    %234 = vector.load %arg16[%c0_111, %c0_112] : memref<1x256xf32, #tpu.memory_space<vmem>>, vector<1x256xf32>
    %235 = vector.broadcast %234 : vector<1x256xf32> to vector<16x256xf32>
    %236 = arith.addf %233, %235 : vector<16x256xf32>
    %c0_113 = arith.constant 0 : index
    %c0_114 = arith.constant 0 : index
    %c0_115 = arith.constant 0 : index
    %237 = vector.load %arg17[%c0_113, %c0_114, %c0_115] : memref<1x16x256xf32, #tpu.memory_space<vmem>>, vector<1x16x256xf32>
    %238 = vector.shape_cast %237 : vector<1x16x256xf32> to vector<16x256xf32>
    %239 = vector.shape_cast %236 : vector<16x256xf32> to vector<1x16x256xf32>
    tpu.vector_store %arg17[%c0_113, %c0_114, %c0_115], %239 {strides = array<i32>} : memref<1x16x256xf32, #tpu.memory_space<vmem>>, vector<1x16x256xf32>,
    return
  }
  func.func @transform_0(%arg0: i32) -> (i32, i32, i32) {
    %c0_i32 = arith.constant 0 : i32
    %c0_i32_0 = arith.constant 0 : i32
    %c0_i32_1 = arith.constant 0 : i32
    return %arg0, %c0_i32, %c0_i32_0 : i32, i32, i32
  }
  func.func @transform_1(%arg0: i32) -> (i32, i32, i32) {
    %c0_i32 = arith.constant 0 : i32
    %c0_i32_0 = arith.constant 0 : i32
    %c0_i32_1 = arith.constant 0 : i32
    return %arg0, %c0_i32, %c0_i32_0 : i32, i32, i32
  }
  func.func @transform_2(%arg0: i32) -> (i32, i32) {
    %c0_i32 = arith.constant 0 : i32
    %c0_i32_0 = arith.constant 0 : i32
    %c0_i32_1 = arith.constant 0 : i32
    return %c0_i32, %c0_i32_0 : i32, i32
  }
  func.func @transform_3(%arg0: i32) -> (i32, i32) {
    %c0_i32 = arith.constant 0 : i32
    %c0_i32_0 = arith.constant 0 : i32
    %c0_i32_1 = arith.constant 0 : i32
    return %c0_i32, %c0_i32_0 : i32, i32
  }
  func.func @transform_4(%arg0: i32) -> (i32, i32) {
    %c0_i32 = arith.constant 0 : i32
    %c0_i32_0 = arith.constant 0 : i32
    %c0_i32_1 = arith.constant 0 : i32
    return %c0_i32, %c0_i32_0 : i32, i32
  }
  func.func @transform_5(%arg0: i32) -> (i32, i32) {
    %c0_i32 = arith.constant 0 : i32
    %c0_i32_0 = arith.constant 0 : i32
    %c0_i32_1 = arith.constant 0 : i32
    return %c0_i32, %c0_i32_0 : i32, i32
  }
  func.func @transform_6(%arg0: i32) -> (i32, i32) {
    %c0_i32 = arith.constant 0 : i32
    %c0_i32_0 = arith.constant 0 : i32
    %c0_i32_1 = arith.constant 0 : i32
    return %c0_i32, %c0_i32_0 : i32, i32
  }
  func.func @transform_7(%arg0: i32) -> (i32, i32) {
    %c0_i32 = arith.constant 0 : i32
    %c0_i32_0 = arith.constant 0 : i32
    %c0_i32_1 = arith.constant 0 : i32
    return %c0_i32, %c0_i32_0 : i32, i32
  }
  func.func @transform_8(%arg0: i32) -> (i32, i32) {
    %c0_i32 = arith.constant 0 : i32
    %c0_i32_0 = arith.constant 0 : i32
    %c0_i32_1 = arith.constant 0 : i32
    return %c0_i32, %c0_i32_0 : i32, i32
  }
  func.func @transform_9(%arg0: i32) -> (i32, i32) {
    %c0_i32 = arith.constant 0 : i32
    %c0_i32_0 = arith.constant 0 : i32
    %c0_i32_1 = arith.constant 0 : i32
    return %c0_i32, %c0_i32_0 : i32, i32
  }
  func.func @transform_10(%arg0: i32) -> (i32, i32) {
    %c0_i32 = arith.constant 0 : i32
    %c0_i32_0 = arith.constant 0 : i32
    %c0_i32_1 = arith.constant 0 : i32
    return %c0_i32, %c0_i32_0 : i32, i32
  }
  func.func @transform_11(%arg0: i32) -> (i32, i32) {
    %c0_i32 = arith.constant 0 : i32
    %c0_i32_0 = arith.constant 0 : i32
    %c0_i32_1 = arith.constant 0 : i32
    return %c0_i32, %c0_i32_0 : i32, i32
  }
  func.func @transform_12(%arg0: i32) -> (i32, i32) {
    %c0_i32 = arith.constant 0 : i32
    %c0_i32_0 = arith.constant 0 : i32
    %c0_i32_1 = arith.constant 0 : i32
    return %c0_i32, %c0_i32_0 : i32, i32
  }
  func.func @transform_13(%arg0: i32) -> (i32, i32) {
    %c0_i32 = arith.constant 0 : i32
    %c0_i32_0 = arith.constant 0 : i32
    %c0_i32_1 = arith.constant 0 : i32
    return %c0_i32, %c0_i32_0 : i32, i32
  }
  func.func @transform_14(%arg0: i32) -> (i32, i32) {
    %c0_i32 = arith.constant 0 : i32
    %c0_i32_0 = arith.constant 0 : i32
    %c0_i32_1 = arith.constant 0 : i32
    return %c0_i32, %c0_i32_0 : i32, i32
  }
  func.func @transform_15(%arg0: i32) -> (i32, i32) {
    %c0_i32 = arith.constant 0 : i32
    %c0_i32_0 = arith.constant 0 : i32
    %c0_i32_1 = arith.constant 0 : i32
    return %c0_i32, %c0_i32_0 : i32, i32
  }
  func.func @transform_16(%arg0: i32) -> (i32, i32, i32) {
    %c0_i32 = arith.constant 0 : i32
    %c0_i32_0 = arith.constant 0 : i32
    %c0_i32_1 = arith.constant 0 : i32
    return %arg0, %c0_i32, %c0_i32_0 : i32, i32, i32
  }
}

</mosaic_0001>

<bundles_post_ra>
// kernel: multimodal_forward.1
= control target key start
LH: loop header
LB: loop body
LE: loop exit
PB: predicated region body
PF: predicated region fallthrough
CT: control target
= control target key end

     0   :  { %s2694_s21 = smov 0   ;;  %s3317_s0 = inlined_call_operand.vmem [shape: f32[2,4,192], index: 0, kind: input, shape index: {}]   ;;  %s3318_s1 = inlined_call_operand.vmem [shape: f32[2,8,128], index: 1, kind: input, shape index: {}]   ;;  %s3319_s2 = inlined_call_operand.vmem [shape: f32[12,128], index: 2, kind: input, shape index: {}]   ;;  %s3320_s3 = inlined_call_operand.vmem [shape: f32[6,128], index: 3, kind: input, shape index: {}]   ;;  %s3321_s4 = inlined_call_operand.vmem [shape: bf16[192,128], index: 4, kind: input, shape index: {}]   ;;  %s3322_s5 = inlined_call_operand.vmem [shape: f32[1,128], index: 5, kind: input, shape index: {}]   ;;  %s3323_s6 = inlined_call_operand.vmem [shape: bf16[128,384], index: 6, kind: input, shape index: {}]   ;;  %s3324_s7 = inlined_call_operand.vmem [shape: f32[1,384], index: 7, kind: input, shape index: {}]   ;;  %s3325_s8 = inlined_call_operand.vmem [shape: bf16[128,128], index: 8, kind: input, shape index: {}]   ;;  %s3326_s9 = inlined_call_operand.vmem [shape: f32[1,128], index: 9, kind: input, shape index: {}]   ;;  %s3327_s10 = inlined_call_operand.vmem [shape: bf16[128,256], index: 10, kind: input, shape index: {}]   ;;  %s3328_s11 = inlined_call_operand.vmem [shape: f32[1,256], index: 11, kind: input, shape index: {}]   ;;  %s3329_s12 = inlined_call_operand.vmem [shape: bf16[256,128], index: 12, kind: input, shape index: {}]   ;;  %s3330_s13 = inlined_call_operand.vmem [shape: f32[1,128], index: 13, kind: input, shape index: {}]   ;;  %s3331_s14 = inlined_call_operand.vmem [shape: bf16[128,256], index: 14, kind: input, shape index: {}]   ;;  %s3332_s15 = inlined_call_operand.vmem [shape: f32[1,256], index: 15, kind: input, shape index: {}]   ;;  %s3333_s16 = inlined_call_operand.vmem [shape: f32[2,16,256], index: 16, kind: output, shape index: {}]  }
   0x1   :  { %3334 = sst [smem:[#allocation5_spill]] %s3317_s0 }
   0x2 LB: > { %s2040_s22 = sadd.s32 4294967295, %s2601_s21   ;;  %p2044_p0 = scmp.ge.s32.totalorder %s2601_s21, 1  ;;  %s2601_s21 = sphi %s2694_s21, %s26_s21  }
   0x3   : > { %p471_p1 = scmp.lt.s32.totalorder %s2601_s21, 3 }
   0x5   : > { %p472_p2 = pnand %p2044_p0, %p471_p1 }
   0x6   : > { %p525_p3 = scmp.lt.s32.totalorder (!%p472_p2), %s2040_s22, 1  ;;  %s3335_s19 = sld [smem:[#allocation5_spill]] (!%p472_p2) }
   0x7   : > { %475 = sbr.rel (%p472_p2) target bundleno = 2399 (0x95f), region = 84  ;;  %s2605_s18 = smov (!%p472_p2), 32  }
   0xc   : > { %v2438_v0 = vld [vmem:[%s3321_s4 + $0x38] sm:$0xff]  ;;  %v2437_v2 = vld [vmem:[%s3321_s4 + $0x30] sm:$0xff]  ;;  %s3337_s22 = smov (!%p525_p3, %s2040_s22), 1  ;;  %v2436_v4 = vld [vmem:[%s3321_s4 + $0x28] sm:$0xff]  ;;  %vm650_vm0 = vcmask 523264   ;;  %v2603_v20 = vmov 0.0  }
   0xd   : > { %v2442_v1 = vld [vmem:[%s3321_s4 + $0x58] sm:$0xff]  ;;  %654 = vmatpush.bf16.msra.mxu0 %v2438_v0  ;;  %v2441_v3 = vld [vmem:[%s3321_s4 + $0x50] sm:$0xff]  ;;  %s2429_s0 = sshll.u32 %s3337_s22, 3  ;;  %v2440_v6 = vld [vmem:[%s3321_s4 + $0x48] sm:$0xff]  ;;  %687 = vst [vmem:[#allocation2 + $0xc] sm:$0xf] %v2603_v20 }
   0xe   : > { %671 = vmatpush.bf16.msra.mxu1 %v2442_v1  ;;  %s529_s20 = scalar_lea.vmem %s3335_s19, %s2429_s0  ;;  %v2435_v7 = vld [vmem:[%s3321_s4 + $0x20] sm:$0xff]  ;;  %v2434_v9 = vld [vmem:[%s3321_s4 + $0x18] sm:$0xff]  ;;  %v2433_v12 = vld [vmem:[%s3321_s4 + $0x10] sm:$0xff]  ;;  %s533_s29 = scalar_lea.vmem %s3318_s1, %s2429_s0  ;;  %v2604_v32 = vmov 128.0   ;;  %vm977_vm8 = vcmask 261120   ;;  %vm1002_vm10 = vcmask 130048  }
   0xf   : > { %v541_v5 = vld [vmem:[%s529_s20] sm:$0xff]  ;;  %v2432_v13 = vld [vmem:[%s3321_s4 + $0x8] sm:$0xff]  ;;  %2540 = vrcp.f32 %v2604_v32  ;;  %v2465_v48 = vld [vmem:[%s3323_s6 + $0xb0] sm:$0xf0]  ;;  %s2606_s19 = smov 64   ;;  %s2607_s20 = smov 96  }
  0x10   : > { %543 = vst [vmem:[#allocation1] ss:$2 sm:$0xff] %v541_v5  ;;  %v2439_v8 = vld [vmem:[%s3321_s4 + $0x40] sm:$0xff]  ;;  %v2185_v47 = vld [vmem:[%s3323_s6 + $0xa8] sm:$0xf]  ;;  %vm1137_vm12 = vcmask 523520  }
  0x11   : > { %655 = vmatpush.bf16.msra.mxu0 %v2437_v2  ;;  %v2431_v14 = vld [vmem:[%s3321_s4] sm:$0xff]  ;;  %v2464_v49 = vld [vmem:[%s3323_s6 + $0xac] sm:$0xf]  ;;  %v2186_v50 = vor.u32 %v2465_v48, %v2185_v47  ;;  %v2187_v51 = vld [vmem:[%s3323_s6 + $0xb4] sm:$0xf0]  ;;  %vm1231_vm13 = vcmask 785920  }
  0x12   : > { %672 = vmatpush.bf16.msra.mxu1 %v2441_v3  ;;  %v683_v17 = vld [vmem:[%s533_s29] sm:$0xff]  ;;  %v2193_v52 = vld [vmem:[%s3323_s6 + $0xb0] sm:$0xf]  ;;  %v2466_v53 = vld [vmem:[%s3323_s6 + $0xb8] sm:$0xf0]  ;;  %v2190_v54 = vor.u32 %v2464_v49, %v2187_v51  ;;  %vm1325_vm14 = vcmask 1048320  }
  0x13   : > { %v684_v18 = vld [vmem:[%s3319_s2 + $0x4] sm:$0xff]  ;;  %v2537_v23 = vld [vmem:[%s3322_s5] ss:$0 sm:$0xff]  ;;  %v2194_v55 = vor.u32 %v2466_v53, %v2193_v52  ;;  %912 = vmatpush.bf16.msra.mxu2 %v2186_v50  ;;  %v2173_v56 = vld [vmem:[%s3323_s6 + $0x90] sm:$0xf]  ;;  %s2430_s26 = sshll.u32 %s3337_s22, 5 }
  0x14   : > { %v685_v19 = vadd.f32 %v684_v18, %v683_v17  ;;  %v680_v26 = vld [vmem:[%s3319_s2] sm:$0xf]  ;;  %926 = vmatpush.bf16.msra.mxu3 %v2190_v54  ;;  %v2462_v57 = vld [vmem:[%s3323_s6 + $0x98] sm:$0xf0]  ;;  %v2461_v58 = vld [vmem:[%s3323_s6 + $0x94] sm:$0xf]  ;;  %s538_s29 = scalar_lea.vmem %s3333_s16, %s2430_s26 }
  0x15   : > { %656 = vmatpush.bf16.msra.mxu0 %v2436_v4  ;;  %v2541_v33 = vpop.eup %2540  ;;  %v2174_v59 = vor.u32 %v2462_v57, %v2173_v56  ;;  %v2175_v60 = vld [vmem:[%s3323_s6 + $0x9c] sm:$0xf0]  ;;  %v2181_v61 = vld [vmem:[%s3323_s6 + $0x98] sm:$0xf]  ;;  %v2463_v62 = vld [vmem:[%s3323_s6 + $0xa0] sm:$0xf0] }
  0x16   : > { %673 = vmatpush.bf16.msra.mxu1 %v2440_v6  ;;  %686 = vst [vmem:[#allocation2 + $0x4] sm:$0xff] %v685_v19  ;;  %v695_v34 = vmul.f32 128.0, %v2541_v33  ;;  %vm699_vm1 = vweird.f32 %v2541_v33  ;;  %v2178_v63 = vor.u32 %v2461_v58, %v2175_v60  ;;  %v2182_v0 = vor.u32 %v2463_v62, %v2181_v61  ;;  %v2161_v1 = vld [vmem:[%s3323_s6 + $0x78] sm:$0xf]  ;;  %v2459_v2 = vld [vmem:[%s3323_s6 + $0x80] sm:$0xf0] }
  0x17   : > { %v545_v10 = vld.sshfl [vmem:[#allocation1 + $0x8] sm:$0xff pattern:$0x75316420]  ;;  %v544_v15 = vld.sshfl [vmem:[#allocation1] sm:$0xff pattern:$0x75316420]  ;;  %913 = vmatpush.bf16.msra.mxu2 %v2174_v59  ;;  %v2162_v4 = vor.u32 %v2459_v2, %v2161_v1 }
  0x18   : > { %v549_v11 = vpack.c.bf16 %v545_v10, %v545_v10  ;;  %v548_v16 = vpack.c.bf16 %v544_v15, %v544_v15  ;;  %v696_v35 = vsub.f32 1.0, %v695_v34  ;;  %927 = vmatpush.bf16.msra.mxu3 %v2178_v63  ;;  %v2458_v3 = vld [vmem:[%s3323_s6 + $0x7c] sm:$0xf]  ;;  %v2163_v5 = vld [vmem:[%s3323_s6 + $0x84] sm:$0xf0] }
  0x19   : > { %657 = vmatpush.bf16.msra.mxu0 %v2435_v7  ;;  %v2169_v6 = vld [vmem:[%s3323_s6 + $0x80] sm:$0xf]  ;;  %v2460_v7 = vld [vmem:[%s3323_s6 + $0x88] sm:$0xf0]  ;;  %v2157_v15 = vld [vmem:[%s3323_s6 + $0x68] sm:$0xf] }
  0x1a   : > { %674 = vmatpush.bf16.msra.mxu1 %v2439_v8  ;;  %v697_v36 = vmul.f32 %v2541_v33, %v696_v35  ;;  %v2166_v8 = vor.u32 %v2458_v3, %v2163_v5  ;;  %v2149_v10 = vld [vmem:[%s3323_s6 + $0x60] sm:$0xf]  ;;  %v2137_v19 = vld [vmem:[%s3323_s6 + $0x48] sm:$0xf]  ;;  %v2453_v20 = vld [vmem:[%s3323_s6 + $0x50] sm:$0xf0] }
  0x1b   : > { %914 = vmatpush.bf16.msra.mxu2 %v2162_v4  ;;  %v2449_v32 = vld [vmem:[%s3323_s6 + $0x34] sm:$0xf]  ;;  %v2127_v34 = vld [vmem:[%s3323_s6 + $0x3c] sm:$0xf0]  ;;  %v2133_v35 = vld [vmem:[%s3323_s6 + $0x38] sm:$0xf] }
  0x1c   : > { %v698_v37 = vadd.f32 %v2541_v33, %v697_v36  ;;  %928 = vmatpush.bf16.msra.mxu3 %v2166_v8  ;;  %v2451_v36 = vld [vmem:[%s3323_s6 + $0x40] sm:$0xf0]  ;;  %v2121_v47 = vld [vmem:[%s3323_s6 + $0x20] sm:$0xf]  ;;  %v2448_v48 = vld [vmem:[%s3323_s6 + $0x28] sm:$0xf0] }
  0x1d   : > { %658 = vmatpush.bf16.msra.mxu0 %v2434_v9  ;;  %2098 = vmatmul.msk.bf16.vlgmr.msra.gmra.mxu1 %vm650_vm0, %v549_v11  ;;  %v2763_v31 = vld [vmem:[#allocation2 + $0x8] sm:$0xff]  ;;  %v2170_v9 = vor.u32 %v2460_v7, %v2169_v6  ;;  %v2456_v11 = vld [vmem:[%s3323_s6 + $0x68] sm:$0xf0]  ;;  %v2122_v50 = vor.u32 %v2448_v48, %v2121_v47  ;;  %v2101_v51 = vld [vmem:[%s3323_s6] sm:$0xf] }
  0x1e   : > { %v2766_v38 = vsel %vm699_vm1, %v2541_v33, %v698_v37  ;;  %940 = vmatpush.bf16.msrb.mxu1 %v2194_v55  ;;  %v2130_v37 = vor.u32 %v2449_v32, %v2127_v34  ;;  %v2444_v52 = vld [vmem:[%s3323_s6 + $0x8] sm:$0xf0]  ;;  %v2443_v53 = vld [vmem:[%s3323_s6 + $0x4] sm:$0xf]  ;;  %v2103_v56 = vld [vmem:[%s3323_s6 + $0xc] sm:$0xf0] }
  0x1f   : > { %v2102_v55 = vor.u32 %v2444_v52, %v2101_v51  ;;  %v2109_v57 = vld [vmem:[%s3323_s6 + $0x8] sm:$0xf]  ;;  %v2445_v58 = vld [vmem:[%s3323_s6 + $0x10] sm:$0xf0]  ;;  %v2106_v60 = vor.u32 %v2443_v53, %v2103_v56 }
  0x20   : > { %v2110_v61 = vor.u32 %v2445_v58, %v2109_v57  ;;  %v960_v58 = vlaneseq }
  0x21   : > { %659 = vmatpush.bf16.msra.mxu0 %v2433_v12  ;;  %v2455_v12 = vld [vmem:[%s3323_s6 + $0x64] sm:$0xf] }
  0x22   : > { %941 = vmatpush.bf16.msrb.mxu1 %v2182_v0 }
  0x25   : > { %660 = vmatpush.bf16.msra.mxu0 %v2432_v13  ;;  %v2150_v13 = vor.u32 %v2456_v11, %v2149_v10 }
  0x26   : > { %942 = vmatpush.bf16.msrb.mxu1 %v2170_v9 }
  0x27   : > { %915 = vmatpush.bf16.msra.mxu2 %v2150_v13  ;;  %v2929_v13 = vld [vmem:[%s3320_s3] sm:$0x3f] }
  0x29   : > { %661 = vmatpush.bf16.msra.mxu0 %v2431_v14  ;;  %v2151_v14 = vld [vmem:[%s3323_s6 + $0x6c] sm:$0xf0] }
  0x2a   : > { %v2154_v17 = vor.u32 %v2455_v12, %v2151_v14 }
  0x2c   : > { %662 = vmatmul.bf16.vlgmr.msra.gmra.mxu0 %v548_v16  ;;  %v2457_v16 = vld [vmem:[%s3323_s6 + $0x70] sm:$0xf0]  ;;  %929 = vmatpush.bf16.msra.mxu3 %v2154_v17 }
  0x2d   : > { %v2158_v18 = vor.u32 %v2457_v16, %v2157_v15  ;;  %v737_v16 = vperm.slane %v2929_v13, 0 }
  0x2f   : > { %943 = vmatpush.bf16.msrb.mxu1 %v2158_v18 }
  0x9a   : > { %v676_v21 = vpop.f32.mrf.mxu1 }
  0xa2   : > { %v678_v22 = vpop.f32.mrf.mxu1 }
  0xa3   : > { %v2138_v22 = vor.u32 %v2453_v20, %v2137_v19 }
  0xa5   : > { %916 = vmatpush.bf16.msra.mxu2 %v2138_v22 }
  0xa9   : > { %v663_v24 = vpop.f32.mrf.mxu0 }
  0xaa   : > { %v664_v25 = vadd.f32 %v2537_v23, %v663_v24  ;;  %v2139_v23 = vld [vmem:[%s3323_s6 + $0x54] sm:$0xf0]  ;;  %v2145_v24 = vld [vmem:[%s3323_s6 + $0x50] sm:$0xf] }
  0xac   : > { %v677_v27 = vadd.f32 %v676_v21, %v664_v25  ;;  %v2452_v21 = vld [vmem:[%s3323_s6 + $0x4c] sm:$0xf]  ;;  %v2454_v25 = vld [vmem:[%s3323_s6 + $0x58] sm:$0xf0] }
  0xae   : > { %v681_v28 = vadd.f32 %v680_v26, %v677_v27  ;;  %v2142_v26 = vor.u32 %v2452_v21, %v2139_v23  ;;  %v2146_v27 = vor.u32 %v2454_v25, %v2145_v24  ;;  %v740_v21 = vperm.slane %v2929_v13, 1 }
  0xb0   : > { %682 = vst [vmem:[#allocation2] sm:$0xf] %v681_v28  ;;  %930 = vmatpush.bf16.msra.mxu3 %v2142_v26  ;;  %944 = vmatpush.bf16.msrb.mxu1 %v2146_v27  ;;  %v2125_v28 = vld [vmem:[%s3323_s6 + $0x30] sm:$0xf] }
  0xb1   : > { %v665_v29 = vpop.f32.mrf.mxu0 }
  0xb2   : > { %v2450_v29 = vld [vmem:[%s3323_s6 + $0x38] sm:$0xf0] }
  0xb3   : > { %v2126_v33 = vor.u32 %v2450_v29, %v2125_v28 }
  0xb4   : > { %931 = vmatpush.bf16.msra.mxu3 %v2130_v37 }
  0xb5   : > { %917 = vmatpush.bf16.msra.mxu2 %v2126_v33 }
  0xb7   : > { %v2760_v30 = vld [vmem:[#allocation2] sm:$0xff] }
  0xb8   : > { %690 = vadd.xlane.f32.xlu0 %v2760_v30 }
  0xc0   : > { %692 = vadd.xlane.f32.xlu0 %v2763_v31 }
 0x12b   : > { %v691_v39 = vpop.xlane.xlu0 %690 }
 0x12c   : > { %v701_v40 = vmul.f32 %v2766_v38, %v691_v39  ;;  %v2134_v39 = vor.u32 %v2451_v36, %v2133_v35 }
 0x12e   : > { %v2770_v41 = vsub.f32 %v2760_v30, %v701_v40  ;;  %945 = vmatpush.bf16.msrb.mxu1 %v2134_v39  ;;  %v2113_v40 = vld [vmem:[%s3323_s6 + $0x18] sm:$0xf] }
 0x130   : > { %v705_v42 = vmul.f32 %v2770_v41, %v2770_v41 }
 0x132   : > { %707 = vadd.xlane.f32.xlu1 %v705_v42  ;;  %v2447_v42 = vld [vmem:[%s3323_s6 + $0x20] sm:$0xf0]  ;;  %946 = vmatpush.bf16.msrb.mxu1 %v2122_v50 }
 0x133   : > { %v693_v43 = vpop.xlane.xlu0 %692 }
 0x134   : > { %v702_v44 = vmul.f32 %v2766_v38, %v693_v43  ;;  %v2446_v43 = vld [vmem:[%s3323_s6 + $0x1c] sm:$0xf] }
 0x136   : > { %v2776_v45 = vsub.f32 %v2763_v31, %v702_v44  ;;  %v2114_v44 = vor.u32 %v2447_v42, %v2113_v40  ;;  %947 = vmatpush.bf16.msrb.mxu1 %v2110_v61 }
 0x138   : > { %v706_v46 = vmul.f32 %v2776_v45, %v2776_v45  ;;  %918 = vmatpush.bf16.msra.mxu2 %v2114_v44 }
 0x13a   : > { %709 = vadd.xlane.f32.xlu1 %v706_v46  ;;  %v2115_v46 = vld [vmem:[%s3323_s6 + $0x24] sm:$0xf0] }
 0x13b   : > { %v2118_v49 = vor.u32 %v2446_v43, %v2115_v46 }
 0x13c   : > { %919 = vmatpush.bf16.msra.mxu2 %v2102_v55 }
 0x13d   : > { %932 = vmatpush.bf16.msra.mxu3 %v2118_v49 }
 0x141   : > { %933 = vmatpush.bf16.msra.mxu3 %v2106_v60  ;;  %v964_v60 = vand.u32 127, %v960_v58 }
 0x1a5   : > { %v708_v54 = vpop.xlane.xlu1 %707 }
 0x1a6   : > { %v711_v59 = vmul.f32 %v708_v54, %v2766_v38 }
 0x1a8   : > { %v713_v62 = vadd.f32 1e-05, %v711_v59  ;;  %v961_v59 = vshrl.u32 %v960_v58, 7 }
 0x1aa   : > { %2542 = vrsqrt.f32 %v713_v62  ;;  %vm721_vm3 = vweird.f32 %v713_v62  ;;  %vm965_vm9 = vcmp.le.s32.totalorder %v964_v60, %v961_v59 }
 0x1ad   : > { %v710_v63 = vpop.xlane.xlu1 %709 }
 0x1ae   : > { %v712_v0 = vmul.f32 %v710_v63, %v2766_v38 }
 0x1b0   : > { %v2543_v1 = vpop.eup %2542  ;;  %v714_v2 = vadd.f32 1e-05, %v712_v0 }
 0x1b1   : > { %v716_v3 = vmul.f32 %v2543_v1, %v713_v62  ;;  %vm722_vm2 = vweird.f32 %v2543_v1  ;;  %v2608_v62 = vmov -1e+30  }
 0x1b2   : > { %2544 = vrsqrt.f32 %v714_v2  ;;  %vm723_vm4 = vmor %vm721_vm3, %vm722_vm2  ;;  %vm731_vm6 = vweird.f32 %v714_v2  ;;  %v967_v63 = vsel %vm965_vm9, 0.0, %v2608_v62 }
 0x1b3   : > { %v717_v4 = vmul.f32 %v2543_v1, %v716_v3 }
 0x1b5   : > { %v718_v5 = vmul.f32 0.5, %v717_v4 }
 0x1b7   : > { %v719_v6 = vsub.f32 1.5, %v718_v5 }
 0x1b8   : > { %v2545_v7 = vpop.eup %2544 }
 0x1b9   : > { %v720_v8 = vmul.f32 %v2543_v1, %v719_v6  ;;  %v726_v9 = vmul.f32 %v2545_v7, %v714_v2  ;;  %vm732_vm5 = vweird.f32 %v2545_v7 }
 0x1ba   : > { %vm733_vm7 = vmor %vm731_vm6, %vm732_vm5 }
 0x1bb   : > { %v727_v10 = vmul.f32 %v2545_v7, %v726_v9  ;;  %v724_v11 = vsel %vm723_vm4, %v2543_v1, %v720_v8  ;;  %v962_v1 = vadd.s32 8, %v961_v59 }
 0x1bc   : > { %v735_v15 = vmul.f32 %v724_v11, %v2770_v41  ;;  %v776_v41 = vld [vmem:[%s3324_s7] sm:$0x7] }
 0x1bd   : > { %v728_v12 = vmul.f32 0.5, %v727_v10  ;;  %v780_v27 = vperm.slane %v776_v41, 2  ;;  %v779_v34 = vperm.slane %v776_v41, 1  ;;  %v778_v43 = vperm.slane %v776_v41, 0 }
 0x1be   : > { %v738_v20 = vmul.f32 %v737_v16, %v735_v15  ;;  %vm966_vm11 = vcmp.le.s32.totalorder %v964_v60, %v962_v1 }
 0x1bf   : > { %v729_v14 = vsub.f32 1.5, %v728_v12  ;;  %v968_v5 = vsel %vm966_vm11, 0.0, %v2608_v62 }
 0x1c0   : > { %v741_v23 = vadd.f32 %v740_v21, %v738_v20 }
 0x1c1   : > { %v730_v17 = vmul.f32 %v2545_v7, %v729_v14 }
 0x1c3   : > { %v734_v18 = vsel %vm733_vm7, %v2545_v7, %v730_v17 }
 0x1c4   : > { %v736_v19 = vmul.f32 %v734_v18, %v2776_v45 }
 0x1c6   : > { %v739_v22 = vmul.f32 %v737_v16, %v736_v19 }
 0x1c8   : > { %v742_v24 = vadd.f32 %v740_v21, %v739_v22 }
 0x1ca   : > { %v743_v25 = vpack.c.bf16 %v742_v24, %v741_v23 }
 0x1cc   : > { %920 = vmatmul.bf16.vlgmr.msra.gmra.mxu2 %v743_v25  ;;  %934 = vmatmul.bf16.vlgmr.msra.gmra.mxu3 %v743_v25 }
 0x1cd   : > { %948 = vmatmul.bf16.vlgmr.msrb.gmra.mxu1 %v743_v25 }
 0x24a   : > { %v949_v26 = vpop.f32.mrf.mxu1 }
 0x24b   : > { %v950_v45 = vadd.f32 %v949_v26, %v780_v27 }
 0x24f   : > { %v935_v28 = vpop.f32.mrf.mxu3  ;;  %v921_v29 = vpop.f32.mrf.mxu2 }
 0x250   : > { %v936_v37 = vadd.f32 %v935_v28, %v779_v34  ;;  %v922_v47 = vadd.f32 %v921_v29, %v778_v43 }
 0x252   : > { %v951_v32 = vpop.f32.mrf.mxu1 }
 0x253   : > { %v952_v33 = vadd.f32 %v951_v32, %v780_v27 }
 0x255   : > { %v2938_v35 = vpack.c.bf16 %v952_v33, %v950_v45 }
 0x257   : > { %1033 = vmatpush.bf16.msrb.mxu2 %v2938_v35  ;;  %v937_v36 = vpop.f32.mrf.mxu3  ;;  %v923_v42 = vpop.f32.mrf.mxu2 }
 0x258   : > { %v938_v39 = vadd.f32 %v937_v36, %v779_v34  ;;  %v924_v46 = vadd.f32 %v923_v42, %v778_v43 }
 0x25a   : > { %v976_v40 = vpack.c.bf16 %v938_v39, %v936_v37  ;;  %v975_v48 = vpack.c.bf16 %v924_v46, %v922_v47 }
 0x25c   : > { %1246 = vrot.lane.b32.xlu1 %v976_v40, %s2605_s18  ;;  %1152 = vrot.lane.b32.xlu0 %v976_v40, %s2606_s19  ;;  %v982_v44 = vsel %vm977_vm8, %v976_v40, 0 }
 0x25d   : > { %1058 = vrot.lane.b32.xlu2 %v976_v40, %s2607_s20  ;;  %991 = vmatpush.bf16.xpose.msrb.mxu0 %v982_v44 }
 0x264   : > { %2195 = vmatmul.msk.bf16.vlgmr.msrb.gmra.mxu0 %vm977_vm8, %v975_v48 }
 0x265   : > { %1055 = vrot.lane.b32.xlu2 %v975_v48, %s2607_s20 }
 0x26d   : > { %1149 = vrot.lane.b32.xlu2 %v975_v48, %s2606_s19 }
 0x275   : > { %1243 = vrot.lane.b32.xlu2 %v975_v48, %s2605_s18 }
 0x2b7   : > { %v1059_v49 = vpop.permute.xlu2 %1058 }
 0x2b8   : > { %v1064_v50 = vsel %vm977_vm8, %v1059_v49, 0 }
 0x2b9   : > { %1073 = vmatpush.bf16.xpose.msrb.mxu3 %v1064_v50 }
 0x2bf   : > { %v1056_v51 = vpop.permute.xlu2 %1055 }
 0x2c0   : > { %2197 = vmatmul.msk.bf16.vlgmr.msrb.gmra.mxu3 %vm977_vm8, %v1056_v51 }
 0x2c7   : > { %v1150_v52 = vpop.permute.xlu2 %1149 }
 0x2ce   : > { %v1247_v53 = vpop.permute.xlu1 %1246  ;;  %v1153_v54 = vpop.permute.xlu0 %1152 }
 0x2cf   : > { %v1252_v55 = vsel %vm977_vm8, %v1247_v53, 0  ;;  %v1158_v56 = vsel %vm977_vm8, %v1153_v54, 0  ;;  %v1244_v57 = vpop.permute.xlu2 %1243 }
 0x2d0   : > { %1167 = vmatpush.bf16.xpose.msra.mxu1 %v1158_v56  ;;  %1261 = vmatpush.bf16.xpose.msra.mxu3 %v1252_v55 }
 0x2d7   : > { %2199 = vmatmul.msk.bf16.vlgmr.msra.gmra.mxu1 %vm977_vm8, %v1150_v52  ;;  %2201 = vmatmul.msk.bf16.vlgmr.msra.gmra.mxu3 %vm977_vm8, %v1244_v57 }
 0x2e1   : > { %v993_v61 = vpop.f32.mrf.mxu0 }
 0x2e2   : > { %v998_v0 = vmul.f32 0.17677669, %v993_v61 }
 0x2e4   : > { %v1000_v2 = vadd.f32 %v998_v0, %v967_v63 }
 0x2e6   : > { %v1003_v3 = vsel %vm1002_vm10, %v1000_v2, -inf }
 0x2e7   : > { %1004 = vmax.xlane.f32.xlu2 %v1003_v3 }
 0x2e9   : > { %v995_v4 = vpop.f32.mrf.mxu0 }
 0x2ea   : > { %v999_v6 = vmul.f32 0.17677669, %v995_v4 }
 0x2ec   : > { %v1001_v7 = vadd.f32 %v999_v6, %v968_v5 }
 0x2ee   : > { %v1006_v8 = vsel %vm1002_vm10, %v1001_v7, -inf }
 0x2ef   : > { %1007 = vmax.xlane.f32.xlu0 %v1006_v8 }
 0x343   : > { %v1075_v9 = vpop.f32.mrf.mxu3 }
 0x344   : > { %v1080_v10 = vmul.f32 0.17677669, %v1075_v9 }
 0x346   : > { %v1082_v11 = vadd.f32 %v1080_v10, %v967_v63 }
 0x348   : > { %v1084_v12 = vsel %vm1002_vm10, %v1082_v11, -inf }
 0x349   : > { %1085 = vmax.xlane.f32.xlu1 %v1084_v12 }
 0x34b   : > { %v1077_v14 = vpop.f32.mrf.mxu3 }
 0x34c   : > { %v1081_v41 = vmul.f32 0.17677669, %v1077_v14 }
 0x34e   : > { %v1083_v34 = vadd.f32 %v1081_v41, %v968_v5 }
 0x350   : > { %v1087_v39 = vsel %vm1002_vm10, %v1083_v34, -inf }
 0x354   : > { %v1169_v15 = vpop.f32.mrf.mxu1 }
 0x355   : > { %v1174_v16 = vmul.f32 0.17677669, %v1169_v15 }
 0x357   : > { %v1176_v17 = vadd.f32 %v1174_v16, %v967_v63 }
 0x359   : > { %v1178_v18 = vsel %vm1002_vm10, %v1176_v17, -inf }
 0x35a   : > { %v1263_v19 = vpop.f32.mrf.mxu3  ;;  %1179 = vmax.xlane.f32.xlu0 %v1178_v18  ;;  %v1005_v21 = vpop.xlane.xlu2 %1004 }
 0x35b   : > { %v1268_v20 = vmul.f32 0.17677669, %v1263_v19  ;;  %v1009_v24 = vsub.f32 %v1000_v2, %v1005_v21 }
 0x35c   : > { %v1171_v22 = vpop.f32.mrf.mxu1 }
 0x35d   : > { %v1175_v23 = vmul.f32 0.17677669, %v1171_v22  ;;  %v1270_v25 = vadd.f32 %v1268_v20, %v967_v63  ;;  %v1011_v28 = vmul.f32 1.442695, %v1009_v24 }
 0x35f   : > { %v1177_v26 = vadd.f32 %v1175_v23, %v968_v5  ;;  %v1272_v29 = vsel %vm1002_vm10, %v1270_v25, -inf  ;;  %2546 = vpow2.f32 %v1011_v28 }
 0x361   : > { %v1181_v27 = vsel %vm1002_vm10, %v1177_v26, -inf }
 0x362   : > { %1105 = vrot.lane.b32.xlu1 %v2938_v35, %s2607_s20  ;;  %1182 = vmax.xlane.f32.xlu2 %v1181_v27  ;;  %v1008_v32 = vpop.xlane.xlu0 %1007  ;;  %v1265_v36 = vpop.f32.mrf.mxu3 }
 0x363   : > { %1273 = vmax.xlane.f32.xlu0 %v1272_v29  ;;  %v1010_v45 = vsub.f32 %v1001_v7, %v1008_v32  ;;  %v1269_v37 = vmul.f32 0.17677669, %v1265_v36 }
 0x365   : > { %v1013_v33 = vmul.f32 1.442695, %v1010_v45  ;;  %v2547_v40 = vpop.eup %2546  ;;  %v1271_v43 = vadd.f32 %v1269_v37, %v968_v5 }
 0x366   : > { %v1015_v4 = vsel %vm1002_vm10, %v2547_v40, 0.0 }
 0x367   : > { %2548 = vpow2.f32 %v1013_v33  ;;  %v1275_v46 = vsel %vm1002_vm10, %v1271_v43, -inf }
 0x36a   : > { %1088 = vmax.xlane.f32.xlu2 %v1087_v39 }
 0x36d   : > { %v2549_v42 = vpop.eup %2548 }
 0x36e   : > { %v1021_v44 = vpack.c.bf16 %v2549_v42, %v2547_v40  ;;  %v1018_v47 = vsel %vm1002_vm10, %v2549_v42, 0.0 }
 0x370   : > { %2196 = vmatmul.msk.bf16.vlgmr.msrb.gmra.mxu2 %vm1002_vm10, %v1021_v44 }
 0x372   : > { %1276 = vmax.xlane.f32.xlu2 %v1275_v46 }
 0x377   : > { %1199 = vrot.lane.b32.xlu0 %v2938_v35, %s2606_s19 }
 0x38a   : > { %1293 = vrot.lane.b32.xlu2 %v2938_v35, %s2605_s18 }
 0x3a1   : > { %1019 = vadd.xlane.f32.xlu0 %v1018_v47 }
 0x3bc   : > { %v1086_v48 = vpop.xlane.xlu1 %1085 }
 0x3bd   : > { %v1090_v49 = vsub.f32 %v1082_v11, %v1086_v48 }
 0x3bf   : > { %v1092_v50 = vmul.f32 1.442695, %v1090_v49 }
 0x3c1   : > { %2550 = vpow2.f32 %v1092_v50 }
 0x3c7   : > { %v2551_v51 = vpop.eup %2550 }
 0x3c8   : > { %v1096_v52 = vsel %vm1002_vm10, %v2551_v51, 0.0 }
 0x3c9   : > { %1097 = vadd.xlane.f32.xlu1 %v1096_v52 }
 0x3cd   : > { %v1180_v53 = vpop.xlane.xlu0 %1179 }
 0x3ce   : > { %v1184_v54 = vsub.f32 %v1176_v17, %v1180_v53 }
 0x3d0   : > { %v1186_v55 = vmul.f32 1.442695, %v1184_v54 }
 0x3d2   : > { %2552 = vpow2.f32 %v1186_v55 }
 0x3d4   : > { %v1106_v56 = vpop.permute.xlu1 %1105 }
 0x3d5   : > { %1118 = vmatpush.bf16.msra.mxu0 %v1106_v56  ;;  %v1183_v57 = vpop.xlane.xlu2 %1182 }
 0x3d6   : > { %v1185_v58 = vsub.f32 %v1177_v26, %v1183_v57  ;;  %v1274_v61 = vpop.xlane.xlu0 %1273  ;;  %v2474_v57 = vld [vmem:[%s3325_s8 + $0x38] sm:$0xff] }
 0x3d7   : > { %v1278_v1 = vsub.f32 %v1270_v25, %v1274_v61  ;;  %1399 = vmatpush.bf16.msrb.mxu1 %v2474_v57  ;;  %v2469_v61 = vld [vmem:[%s3325_s8 + $0x10] sm:$0xff]  ;;  %v2253_v57 = vld [vmem:[%s3327_s10 + $0x20] sm:$0xf] }
 0x3d8   : > { %v2553_v35 = vpop.eup %2552  ;;  %v1188_v59 = vmul.f32 1.442695, %v1185_v58  ;;  %v2473_v58 = vld [vmem:[%s3325_s8 + $0x30] sm:$0xff] }
 0x3d9   : > { %v1190_v60 = vsel %vm1002_vm10, %v2553_v35, 0.0  ;;  %v1280_v5 = vmul.f32 1.442695, %v1278_v1 }
 0x3da   : > { %2554 = vpow2.f32 %v1188_v59  ;;  %1191 = vadd.xlane.f32.xlu2 %v1190_v60  ;;  %v2471_v59 = vld [vmem:[%s3325_s8 + $0x20] sm:$0xff]  ;;  %v2470_v60 = vld [vmem:[%s3325_s8 + $0x18] sm:$0xff] }
 0x3db   : > { %1400 = vmatpush.bf16.msrb.mxu1 %v2473_v58  ;;  %v2480_v58 = vld [vmem:[%s3327_s10 + $0x24] sm:$0xf0] }
 0x3dd   : > { %v1089_v62 = vpop.xlane.xlu2 %1088 }
 0x3de   : > { %v1091_v63 = vsub.f32 %v1083_v34, %v1089_v62 }
 0x3e0   : > { %v2555_v0 = vpop.eup %2554  ;;  %v1094_v2 = vmul.f32 1.442695, %v1091_v63  ;;  %v2468_v63 = vld [vmem:[%s3325_s8 + $0x8] sm:$0xff] }
 0x3e1   : > { %v1193_v3 = vsel %vm1002_vm10, %v2555_v0, 0.0  ;;  %v1196_v14 = vpack.c.bf16 %v2555_v0, %v2553_v35  ;;  %v2472_v35 = vld [vmem:[%s3325_s8 + $0x28] sm:$0xff]  ;;  %v2467_v0 = vld [vmem:[%s3325_s8] sm:$0xff] }
 0x3e2   : > { %2556 = vpow2.f32 %v1094_v2  ;;  %1194 = vadd.xlane.f32.xlu1 %v1193_v3  ;;  %1016 = vadd.xlane.f32.xlu2 %v1015_v4 }
 0x3e3   : > { %2558 = vpow2.f32 %v1280_v5  ;;  %1401 = vmatpush.bf16.msrb.mxu1 %v2472_v35  ;;  %v2479_v35 = vld [vmem:[%s3327_s10 + $0x24] sm:$0xf] }
 0x3e5   : > { %v1277_v6 = vpop.xlane.xlu2 %1276 }
 0x3e6   : > { %v1279_v7 = vsub.f32 %v1271_v43, %v1277_v6 }
 0x3e7   : > { %1402 = vmatpush.bf16.msrb.mxu1 %v2471_v59  ;;  %v2254_v59 = vor.u32 %v2480_v58, %v2253_v57  ;;  %v2500_v57 = vld [vmem:[%s3329_s12 + $0x48] sm:$0xff] }
 0x3e8   : > { %v2557_v8 = vpop.eup %2556  ;;  %v1282_v9 = vmul.f32 1.442695, %v1279_v7 }
 0x3e9   : > { %v1102_v10 = vpack.c.bf16 %v2557_v8, %v2551_v51  ;;  %v1200_v11 = vpop.permute.xlu0 %1199  ;;  %v1099_v12 = vsel %vm1002_vm10, %v2557_v8, 0.0  ;;  %v2559_v16 = vpop.eup %2558 }
 0x3ea   : > { %2560 = vpow2.f32 %v1282_v9  ;;  %1212 = vmatpush.bf16.msra.mxu2 %v1200_v11  ;;  %1100 = vadd.xlane.f32.xlu0 %v1099_v12  ;;  %v1284_v19 = vsel %vm1002_vm10, %v2559_v16, 0.0  ;;  %v2538_v9 = vld [vmem:[%s3326_s9] ss:$0 sm:$0xff] }
 0x3eb   : > { %2198 = vmatmul.msk.bf16.vlgmr.msra.gmra.mxu0 %vm1002_vm10, %v1102_v10  ;;  %1403 = vmatpush.bf16.msrb.mxu1 %v2470_v60  ;;  %v2255_v60 = vld [vmem:[%s3327_s10 + $0x28] sm:$0xf0] }
 0x3ed   : > { %2200 = vmatmul.msk.bf16.vlgmr.msra.gmra.mxu2 %vm1002_vm10, %v1196_v14  ;;  %v1294_v15 = vpop.permute.xlu2 %1293 }
 0x3ee   : > { %1306 = vmatpush.bf16.msrb.mxu0 %v1294_v15 }
 0x3ef   : > { %1404 = vmatpush.bf16.msrb.mxu1 %v2469_v61  ;;  %v2258_v61 = vor.u32 %v2479_v35, %v2255_v60 }
 0x3f0   : > { %v2561_v17 = vpop.eup %2560 }
 0x3f1   : > { %v1287_v18 = vsel %vm1002_vm10, %v2561_v17, 0.0  ;;  %v1290_v20 = vpack.c.bf16 %v2561_v17, %v2559_v16 }
 0x3f2   : > { %1288 = vadd.xlane.f32.xlu1 %v1287_v18  ;;  %1285 = vadd.xlane.f32.xlu0 %v1284_v19 }
 0x3f3   : > { %v1035_v21 = vpop.f32.mrf.mxu2  ;;  %1405 = vmatpush.bf16.msrb.mxu1 %v2468_v63  ;;  %v2478_v63 = vld [vmem:[%s3327_s10 + $0x14] sm:$0xf0] }
 0x3f7   : > { %1406 = vmatpush.bf16.msrb.mxu1 %v2467_v0  ;;  %v2477_v0 = vld [vmem:[%s3327_s10 + $0x14] sm:$0xf] }
 0x3fb   : > { %2202 = vmatmul.msk.bf16.vlgmr.msrb.gmra.mxu0 %vm1002_vm10, %v1290_v20  ;;  %v1037_v24 = vpop.f32.mrf.mxu2 }
 0x414   : > { %v1020_v22 = vpop.xlane.xlu0 %1019 }
 0x415   : > { %2562 = vrcp.f32 %v1020_v22 }
 0x41b   : > { %v2563_v23 = vpop.eup %2562 }
 0x41c   : > { %v1043_v25 = vmul.f32 %v2563_v23, %v1037_v24  ;;  %v2293_v23 = vld [vmem:[%s3327_s10 + $0x70] sm:$0xf]  ;;  %v2490_v24 = vld [vmem:[%s3327_s10 + $0x74] sm:$0xf0] }
 0x41e   : > { %1045 = vst.msk [vmem:[#allocation4 + $0x8] sm:$0xff] %vm977_vm8, %v1043_v25  ;;  %v2489_v25 = vld [vmem:[%s3327_s10 + $0x74] sm:$0xf] }
 0x43c   : > { %v1098_v29 = vpop.xlane.xlu1 %1097 }
 0x44d   : > { %v1192_v26 = vpop.xlane.xlu2 %1191 }
 0x455   : > { %v1017_v41 = vpop.xlane.xlu2 %1016  ;;  %v1195_v36 = vpop.xlane.xlu1 %1194 }
 0x456   : > { %2564 = vrcp.f32 %v1017_v41  ;;  %v2295_v41 = vld [vmem:[%s3327_s10 + $0x78] sm:$0xf0] }
 0x457   : > { %2566 = vrcp.f32 %v1098_v29  ;;  %v2488_v29 = vld [vmem:[%s3327_s10 + $0x64] sm:$0xf0] }
 0x458   : > { %2568 = vrcp.f32 %v1192_v26  ;;  %v2294_v26 = vor.u32 %v2490_v24, %v2293_v23 }
 0x45a   : > { %1564 = vmatpush.bf16.msrb.mxu2 %v2294_v26 }
 0x45c   : > { %v2565_v27 = vpop.eup %2564 }
 0x45d   : > { %v1042_v28 = vmul.f32 %v2565_v27, %v1035_v21  ;;  %v1101_v32 = vpop.xlane.xlu0 %1100  ;;  %v2567_v45 = vpop.eup %2566  ;;  %v2298_v27 = vor.u32 %v2489_v25, %v2295_v41 }
 0x45e   : > { %2570 = vrcp.f32 %v1101_v32  ;;  %v2569_v37 = vpop.eup %2568  ;;  %v2487_v32 = vld [vmem:[%s3327_s10 + $0x64] sm:$0xf] }
 0x45f   : > { %1044 = vst.msk [vmem:[#allocation4] sm:$0xff] %vm977_vm8, %v1042_v28  ;;  %2572 = vrcp.f32 %v1195_v36  ;;  %1578 = vmatpush.bf16.msrb.mxu3 %v2298_v27  ;;  %v2285_v28 = vld [vmem:[%s3327_s10 + $0x60] sm:$0xf]  ;;  %v2277_v36 = vld [vmem:[%s3327_s10 + $0x50] sm:$0xf] }
 0x464   : > { %v2571_v40 = vpop.eup %2570 }
 0x465   : > { %v1286_v39 = vpop.xlane.xlu0 %1285  ;;  %v2573_v47 = vpop.eup %2572 }
 0x466   : > { %2574 = vrcp.f32 %v1286_v39  ;;  %v1289_v48 = vpop.xlane.xlu1 %1288  ;;  %v2485_v39 = vld [vmem:[%s3327_s10 + $0x54] sm:$0xf] }
 0x467   : > { %2576 = vrcp.f32 %v1289_v48 }
 0x468   : > { %v1120_v33 = vpop.f32.mrf.mxu0 }
 0x469   : > { %v1127_v34 = vmul.f32 %v2567_v45, %v1120_v33  ;;  %v2286_v45 = vor.u32 %v2488_v29, %v2285_v28  ;;  %v2287_v33 = vld [vmem:[%s3327_s10 + $0x68] sm:$0xf0] }
 0x46b   : > { %1131 = vrot.lane.b32.xlu1 %v1127_v34, %s2605_s18  ;;  %v2290_v34 = vor.u32 %v2487_v32, %v2287_v33  ;;  %1565 = vmatpush.bf16.msrb.mxu2 %v2286_v45  ;;  %v1455_v45 = vperm.slane %v2929_v13, 2 }
 0x46c   : > { %v2575_v49 = vpop.eup %2574 }
 0x46d   : > { %v2577_v54 = vpop.eup %2576  ;;  %1579 = vmatpush.bf16.msrb.mxu3 %v2290_v34 }
 0x470   : > { %v1214_v42 = vpop.f32.mrf.mxu2  ;;  %v1122_v43 = vpop.f32.mrf.mxu0 }
 0x471   : > { %v1221_v44 = vmul.f32 %v2569_v37, %v1214_v42  ;;  %v1128_v46 = vmul.f32 %v2571_v40, %v1122_v43  ;;  %v2486_v37 = vld [vmem:[%s3327_s10 + $0x54] sm:$0xf0]  ;;  %v2279_v42 = vld [vmem:[%s3327_s10 + $0x58] sm:$0xf0] }
 0x472   : > { %v2278_v40 = vor.u32 %v2486_v37, %v2277_v36  ;;  %v2282_v43 = vor.u32 %v2485_v39, %v2279_v42  ;;  %v1458_v39 = vperm.slane %v2929_v13, 3  ;;  %v2497_v13 = vld [vmem:[%s3329_s12 + $0x30] sm:$0xff] }
 0x473   : > { %1225 = vrot.lane.b32.xlu0 %v1221_v44, %s2606_s19  ;;  %1133 = vrot.lane.b32.xlu2 %v1128_v46, %s2605_s18  ;;  %v2269_v44 = vld [vmem:[%s3327_s10 + $0x40] sm:$0xf]  ;;  %v2484_v46 = vld [vmem:[%s3327_s10 + $0x44] sm:$0xf0] }
 0x474   : > { %1566 = vmatpush.bf16.msrb.mxu2 %v2278_v40  ;;  %1580 = vmatpush.bf16.msrb.mxu3 %v2282_v43  ;;  %v2270_v48 = vor.u32 %v2484_v46, %v2269_v44  ;;  %v2506_v46 = vld [vmem:[%s3329_s12 + $0x78] sm:$0xff] }
 0x475   : > { %1776 = vmatpush.bf16.msra.mxu1 %v2506_v46 }
 0x478   : > { %v1216_v50 = vpop.f32.mrf.mxu2  ;;  %v1308_v51 = vpop.f32.mrf.mxu0  ;;  %1567 = vmatpush.bf16.msrb.mxu2 %v2270_v48  ;;  %v2504_v48 = vld [vmem:[%s3329_s12 + $0x68] sm:$0xff] }
 0x479   : > { %v1222_v52 = vmul.f32 %v2573_v47, %v1216_v50  ;;  %v1315_v53 = vmul.f32 %v2575_v49, %v1308_v51  ;;  %v2483_v47 = vld [vmem:[%s3327_s10 + $0x44] sm:$0xf]  ;;  %v2271_v49 = vld [vmem:[%s3327_s10 + $0x48] sm:$0xf0]  ;;  %v2261_v51 = vld [vmem:[%s3327_s10 + $0x30] sm:$0xf] }
 0x47a   : > { %v2274_v50 = vor.u32 %v2483_v47, %v2271_v49  ;;  %v2496_v47 = vld [vmem:[%s3329_s12 + $0x28] sm:$0xff]  ;;  %v2495_v49 = vld [vmem:[%s3329_s12 + $0x20] sm:$0xff] }
 0x47b   : > { %1227 = vrot.lane.b32.xlu1 %v1222_v52, %s2606_s19  ;;  %1319 = vrot.lane.b32.xlu0 %v1315_v53, %s2607_s20  ;;  %v2482_v52 = vld [vmem:[%s3327_s10 + $0x34] sm:$0xf0]  ;;  %v2481_v53 = vld [vmem:[%s3327_s10 + $0x34] sm:$0xf] }
 0x47c   : > { %1581 = vmatpush.bf16.msrb.mxu3 %v2274_v50  ;;  %v2503_v50 = vld [vmem:[%s3329_s12 + $0x60] sm:$0xff] }
 0x480   : > { %v1310_v55 = vpop.f32.mrf.mxu0 }
 0x481   : > { %v1316_v56 = vmul.f32 %v2577_v54, %v1310_v55  ;;  %v2262_v54 = vor.u32 %v2482_v52, %v2261_v51  ;;  %v2263_v55 = vld [vmem:[%s3327_s10 + $0x38] sm:$0xf0] }
 0x482   : > { %v2494_v51 = vld [vmem:[%s3329_s12 + $0x18] sm:$0xff] }
 0x483   : > { %1321 = vrot.lane.b32.xlu2 %v1316_v56, %s2607_s20  ;;  %v2266_v56 = vor.u32 %v2481_v53, %v2263_v55  ;;  %1568 = vmatpush.bf16.msrb.mxu2 %v2262_v54  ;;  %v2502_v52 = vld [vmem:[%s3329_s12 + $0x58] sm:$0xff]  ;;  %v2493_v53 = vld [vmem:[%s3329_s12 + $0x10] sm:$0xff]  ;;  %v1478_v55 = vld [vmem:[%s3328_s11] sm:$0x3] }
 0x484   : > { %v2501_v54 = vld [vmem:[%s3329_s12 + $0x50] sm:$0xff]  ;;  %v1480_v58 = vperm.slane %v1478_v55, 0  ;;  %v1481_v35 = vperm.slane %v1478_v55, 1 }
 0x485   : > { %1582 = vmatpush.bf16.msrb.mxu3 %v2266_v56  ;;  %v2492_v56 = vld [vmem:[%s3329_s12 + $0x8] sm:$0xff] }
 0x487   : > { %1569 = vmatpush.bf16.msrb.mxu2 %v2254_v59 }
 0x489   : > { %1583 = vmatpush.bf16.msrb.mxu3 %v2258_v61  ;;  %v2491_v61 = vld [vmem:[%s3329_s12] sm:$0xff] }
 0x4cd   : > { %v1134_v62 = vpop.permute.xlu2 %1133 }
 0x4ce   : > { %1139 = vst.msk [vmem:[#allocation4 + $0x8] sm:$0xff] %vm1137_vm12, %v1134_v62  ;;  %v2245_v62 = vld [vmem:[%s3327_s10 + $0x10] sm:$0xf] }
 0x4dd   : > { %v1132_v1 = vpop.permute.xlu1 %1131  ;;  %v1322_v5 = vpop.permute.xlu2 %1321 }
 0x4de   : > { %1138 = vst.msk [vmem:[#allocation4] sm:$0xff] %vm1137_vm12, %v1132_v1  ;;  %v2246_v1 = vor.u32 %v2478_v63, %v2245_v62  ;;  %v2499_v62 = vld [vmem:[%s3329_s12 + $0x40] sm:$0xff] }
 0x4e0   : > { %1570 = vmatpush.bf16.msrb.mxu2 %v2246_v1 }
 0x4e5   : > { %v1226_v2 = vpop.permute.xlu0 %1225 }
 0x4e6   : > { %1232 = vst.msk [vmem:[#allocation4] sm:$0xff] %vm1231_vm13, %v1226_v2  ;;  %v2247_v2 = vld [vmem:[%s3327_s10 + $0x18] sm:$0xf0] }
 0x4ed   : > { %v1228_v3 = vpop.permute.xlu1 %1227  ;;  %v1320_v4 = vpop.permute.xlu0 %1319 }
 0x4ee   : > { %1233 = vst.msk [vmem:[#allocation4 + $0x8] sm:$0xff] %vm1231_vm13, %v1228_v3  ;;  %v2250_v3 = vor.u32 %v2477_v0, %v2247_v2 }
 0x4ef   : > { %1327 = vst.msk [vmem:[#allocation4 + $0x8] sm:$0xff] %vm1325_vm14, %v1322_v5  ;;  %v2476_v5 = vld [vmem:[%s3327_s10 + $0x4] sm:$0xf0] }
 0x4f0   : > { %1326 = vst.msk [vmem:[#allocation4] sm:$0xff] %vm1325_vm14, %v1320_v4  ;;  %v2237_v4 = vld [vmem:[%s3327_s10] sm:$0xf]  ;;  %1584 = vmatpush.bf16.msrb.mxu3 %v2250_v3 }
 0x4f6   : > { %v1329_v6 = vld [vmem:[#allocation4 + $0x8] sm:$0xff] }
 0x4f7   : > { %v1328_v7 = vld [vmem:[#allocation4] sm:$0xff] }
 0x4f8   : > { %v1330_v8 = vpack.c.bf16 %v1329_v6, %v1328_v7  ;;  %v2475_v6 = vld [vmem:[%s3327_s10 + $0x4] sm:$0xf] }
 0x4fa   : > { %1407 = vmatmul.bf16.vlgmr.msrb.gmra.mxu1 %v1330_v8  ;;  %v2238_v8 = vor.u32 %v2476_v5, %v2237_v4 }
 0x4fc   : > { %1571 = vmatpush.bf16.msrb.mxu2 %v2238_v8 }
 0x577   : > { %v1408_v10 = vpop.f32.mrf.mxu1 }
 0x578   : > { %v1409_v11 = vadd.f32 %v2538_v9, %v1408_v10 }
 0x57a   : > { %v3017_v12 = vadd.f32 %v1409_v11, %v2760_v30 }
 0x57c   : > { %1415 = vadd.xlane.f32.xlu1 %v3017_v12 }
 0x57f   : > { %v1410_v14 = vpop.f32.mrf.mxu1 }
 0x580   : > { %v1411_v15 = vadd.f32 %v2538_v9, %v1410_v14  ;;  %v2239_v9 = vld [vmem:[%s3327_s10 + $0x8] sm:$0xf0] }
 0x581   : > { %v2242_v11 = vor.u32 %v2475_v6, %v2239_v9 }
 0x582   : > { %v3021_v16 = vadd.f32 %v1411_v15, %v2763_v31 }
 0x583   : > { %1585 = vmatpush.bf16.msrb.mxu3 %v2242_v11 }
 0x584   : > { %1417 = vadd.xlane.f32.xlu0 %v3021_v16 }
 0x5ef   : > { %v1416_v17 = vpop.xlane.xlu1 %1415 }
 0x5f0   : > { %v1419_v18 = vmul.f32 %v1416_v17, %v2766_v38 }
 0x5f2   : > { %v3026_v19 = vsub.f32 %v3017_v12, %v1419_v18 }
 0x5f4   : > { %v1423_v20 = vmul.f32 %v3026_v19, %v3026_v19 }
 0x5f6   : > { %1425 = vadd.xlane.f32.xlu2 %v1423_v20 }
 0x5f7   : > { %v1418_v30 = vpop.xlane.xlu0 %1417 }
 0x5f8   : > { %v1420_v21 = vmul.f32 %v1418_v30, %v2766_v38 }
 0x5fa   : > { %v3032_v22 = vsub.f32 %v3021_v16, %v1420_v21 }
 0x5fc   : > { %v1424_v31 = vmul.f32 %v3032_v22, %v3032_v22 }
 0x5fe   : > { %1427 = vadd.xlane.f32.xlu1 %v1424_v31 }
 0x669   : > { %v1426_v7 = vpop.xlane.xlu2 %1425 }
 0x66a   : > { %v1429_v10 = vmul.f32 %v1426_v7, %v2766_v38 }
 0x66c   : > { %v1431_v14 = vadd.f32 1e-05, %v1429_v10 }
 0x66e   : > { %2578 = vrsqrt.f32 %v1431_v14  ;;  %vm1439_vm0 = vweird.f32 %v1431_v14 }
 0x671   : > { %v1428_v15 = vpop.xlane.xlu1 %1427 }
 0x672   : > { %v1430_v17 = vmul.f32 %v1428_v15, %v2766_v38 }
 0x674   : > { %v2579_v18 = vpop.eup %2578  ;;  %v1432_v20 = vadd.f32 1e-05, %v1430_v17 }
 0x675   : > { %v1434_v30 = vmul.f32 %v2579_v18, %v1431_v14  ;;  %vm1440_vm15 = vweird.f32 %v2579_v18 }
 0x676   : > { %2580 = vrsqrt.f32 %v1432_v20  ;;  %vm1441_vm1 = vmor %vm1439_vm0, %vm1440_vm15  ;;  %vm1449_vm3 = vweird.f32 %v1432_v20 }
 0x677   : > { %v1435_v21 = vmul.f32 %v2579_v18, %v1434_v30 }
 0x679   : > { %v1436_v31 = vmul.f32 0.5, %v1435_v21 }
 0x67b   : > { %v1437_v23 = vsub.f32 1.5, %v1436_v31 }
 0x67c   : > { %v2581_v24 = vpop.eup %2580 }
 0x67d   : > { %v1438_v25 = vmul.f32 %v2579_v18, %v1437_v23  ;;  %v1444_v26 = vmul.f32 %v2581_v24, %v1432_v20  ;;  %vm1450_vm2 = vweird.f32 %v2581_v24 }
 0x67e   : > { %vm1451_vm4 = vmor %vm1449_vm3, %vm1450_vm2 }
 0x67f   : > { %v1445_v41 = vmul.f32 %v2581_v24, %v1444_v26  ;;  %v1442_v27 = vsel %vm1441_vm1, %v2579_v18, %v1438_v25 }
 0x680   : > { %v1453_v32 = vmul.f32 %v1442_v27, %v3026_v19  ;;  %v2498_v19 = vld [vmem:[%s3329_s12 + $0x38] sm:$0xff] }
 0x681   : > { %v1446_v28 = vmul.f32 0.5, %v1445_v41  ;;  %1762 = vmatpush.bf16.msra.mxu0 %v2498_v19 }
 0x682   : > { %v1456_v37 = vmul.f32 %v1455_v45, %v1453_v32 }
 0x683   : > { %v1447_v29 = vsub.f32 1.5, %v1446_v28 }
 0x684   : > { %v1459_v42 = vadd.f32 %v1458_v39, %v1456_v37 }
 0x685   : > { %v1448_v33 = vmul.f32 %v2581_v24, %v1447_v29  ;;  %1763 = vmatpush.bf16.msra.mxu0 %v2497_v13 }
 0x687   : > { %v1452_v34 = vsel %vm1451_vm4, %v2581_v24, %v1448_v33 }
 0x688   : > { %v1454_v36 = vmul.f32 %v1452_v34, %v3032_v22  ;;  %v2505_v22 = vld [vmem:[%s3329_s12 + $0x70] sm:$0xff] }
 0x689   : > { %1777 = vmatpush.bf16.msra.mxu1 %v2505_v22  ;;  %1764 = vmatpush.bf16.msra.mxu0 %v2496_v47  ;;  %v2539_v47 = vld [vmem:[%s3330_s13] ss:$0 sm:$0xff] }
 0x68a   : > { %v1457_v40 = vmul.f32 %v1455_v45, %v1454_v36 }
 0x68c   : > { %v1460_v43 = vadd.f32 %v1458_v39, %v1457_v40 }
 0x68d   : > { %1778 = vmatpush.bf16.msra.mxu1 %v2504_v48  ;;  %1765 = vmatpush.bf16.msra.mxu0 %v2495_v49 }
 0x68e   : > { %v1461_v44 = vpack.c.bf16 %v1460_v43, %v1459_v42 }
 0x690   : > { %1572 = vmatmul.bf16.vlgmr.msrb.gmra.mxu2 %v1461_v44  ;;  %1586 = vmatmul.bf16.vlgmr.msrb.gmra.mxu3 %v1461_v44 }
 0x691   : > { %1779 = vmatpush.bf16.msra.mxu1 %v2503_v50  ;;  %1766 = vmatpush.bf16.msra.mxu0 %v2494_v51 }
 0x695   : > { %1780 = vmatpush.bf16.msra.mxu1 %v2502_v52  ;;  %1767 = vmatpush.bf16.msra.mxu0 %v2493_v53 }
 0x699   : > { %1781 = vmatpush.bf16.msra.mxu1 %v2501_v54  ;;  %1768 = vmatpush.bf16.msra.mxu0 %v2492_v56 }
 0x69d   : > { %1782 = vmatpush.bf16.msra.mxu1 %v2500_v57  ;;  %1769 = vmatpush.bf16.msra.mxu0 %v2491_v61 }
 0x6a1   : > { %1783 = vmatpush.bf16.msra.mxu1 %v2499_v62 }
 0x713   : > { %v1573_v59 = vpop.f32.mrf.mxu2  ;;  %v1587_v60 = vpop.f32.mrf.mxu3 }
 0x714   : > { %v1574_v63 = vadd.f32 %v1573_v59, %v1480_v58  ;;  %v1588_v0 = vadd.f32 %v1587_v60, %v1481_v35 }
 0x716   : > { %v1592_v1 = vmul.f32 %v1574_v63, %v1574_v63  ;;  %v1593_v2 = vmul.f32 %v1588_v0, %v1588_v0 }
 0x718   : > { %v1596_v3 = vmul.f32 %v1592_v1, %v1574_v63  ;;  %v1597_v4 = vmul.f32 %v1593_v2, %v1588_v0  ;;  %v2521_v1 = vld [vmem:[%s3331_s14 + $0x74] sm:$0xf] }
 0x71a   : > { %v1600_v5 = vmul.f32 0.044715, %v1596_v3  ;;  %v1601_v6 = vmul.f32 0.044715, %v1597_v4  ;;  %v2423_v3 = vld [vmem:[%s3331_s14 + $0x78] sm:$0xf0] }
 0x71b   : > { %v1575_v7 = vpop.f32.mrf.mxu2  ;;  %v1589_v8 = vpop.f32.mrf.mxu3  ;;  %v2426_v4 = vor.u32 %v2521_v1, %v2423_v3 }
 0x71c   : > { %v1604_v9 = vadd.f32 %v1600_v5, %v1574_v63  ;;  %v1605_v10 = vadd.f32 %v1601_v6, %v1588_v0  ;;  %v1576_v11 = vadd.f32 %v1575_v7, %v1480_v58  ;;  %v1590_v14 = vadd.f32 %v1589_v8, %v1481_v35  ;;  %v2413_v5 = vld [vmem:[%s3331_s14 + $0x60] sm:$0xf]  ;;  %v2520_v6 = vld [vmem:[%s3331_s14 + $0x64] sm:$0xf0]  ;;  %v2519_v7 = vld [vmem:[%s3331_s14 + $0x64] sm:$0xf] }
 0x71d   : > { %1955 = vmatpush.bf16.msra.mxu3 %v2426_v4  ;;  %v2414_v8 = vor.u32 %v2520_v6, %v2413_v5  ;;  %v2594_v4 = vld [vmem:[%s3320_s3] sm:$0x3f] }
 0x71e   : > { %v1608_v15 = vmul.f32 0.7978846, %v1604_v9  ;;  %v1594_v17 = vmul.f32 %v1576_v11, %v1576_v11  ;;  %v1595_v18 = vmul.f32 %v1590_v14, %v1590_v14  ;;  %v1609_v20 = vmul.f32 0.7978846, %v1605_v10  ;;  %v2415_v9 = vld [vmem:[%s3331_s14 + $0x68] sm:$0xf0] }
 0x71f   : > { %v2418_v10 = vor.u32 %v2519_v7, %v2415_v9  ;;  %v1832_v5 = vperm.slane %v2594_v4, 4 }
 0x720   : > { %v1598_v30 = vmul.f32 %v1594_v17, %v1576_v11  ;;  %v1599_v21 = vmul.f32 %v1595_v18, %v1590_v14  ;;  %2582 = vtanh.f32 %v1608_v15  ;;  %v2517_v15 = vld [vmem:[%s3331_s14 + $0x54] sm:$0xf]  ;;  %v2407_v18 = vld [vmem:[%s3331_s14 + $0x58] sm:$0xf0] }
 0x721   : > { %2584 = vtanh.f32 %v1609_v20  ;;  %1956 = vmatpush.bf16.msra.mxu3 %v2418_v10  ;;  %v2410_v20 = vor.u32 %v2517_v15, %v2407_v18  ;;  %v1835_v10 = vperm.slane %v2594_v4, 5 }
 0x722   : > { %v1602_v31 = vmul.f32 0.044715, %v1598_v30  ;;  %v1603_v23 = vmul.f32 0.044715, %v1599_v21  ;;  %v2397_v30 = vld [vmem:[%s3331_s14 + $0x40] sm:$0xf] }
 0x723   : > { %v2516_v21 = vld [vmem:[%s3331_s14 + $0x44] sm:$0xf0] }
 0x724   : > { %v1606_v24 = vadd.f32 %v1602_v31, %v1576_v11  ;;  %v1607_v25 = vadd.f32 %v1603_v23, %v1590_v14  ;;  %v2515_v31 = vld [vmem:[%s3331_s14 + $0x44] sm:$0xf]  ;;  %v2398_v23 = vor.u32 %v2516_v21, %v2397_v30 }
 0x725   : > { %1957 = vmatpush.bf16.msra.mxu3 %v2410_v20 }
 0x726   : > { %v1610_v26 = vmul.f32 0.7978846, %v1606_v24  ;;  %v1611_v41 = vmul.f32 0.7978846, %v1607_v25  ;;  %v2583_v27 = vpop.eup %2582  ;;  %v2399_v24 = vld [vmem:[%s3331_s14 + $0x48] sm:$0xf0] }
 0x727   : > { %v2585_v28 = vpop.eup %2584  ;;  %v1616_v29 = vadd.f32 1.0, %v2583_v27  ;;  %v2402_v25 = vor.u32 %v2515_v31, %v2399_v24  ;;  %v2513_v27 = vld [vmem:[%s3331_s14 + $0x34] sm:$0xf] }
 0x728   : > { %2586 = vtanh.f32 %v1610_v26  ;;  %v1617_v32 = vadd.f32 1.0, %v2585_v28  ;;  %v2389_v26 = vld [vmem:[%s3331_s14 + $0x30] sm:$0xf] }
 0x729   : > { %2588 = vtanh.f32 %v1611_v41  ;;  %v1620_v34 = vmul.f32 0.5, %v1616_v29  ;;  %1958 = vmatpush.bf16.msra.mxu3 %v2402_v25  ;;  %v2514_v41 = vld [vmem:[%s3331_s14 + $0x34] sm:$0xf0]  ;;  %v2391_v29 = vld [vmem:[%s3331_s14 + $0x38] sm:$0xf0] }
 0x72a   : > { %v1621_v37 = vmul.f32 0.5, %v1617_v32  ;;  %v2390_v28 = vor.u32 %v2514_v41, %v2389_v26  ;;  %v2394_v32 = vor.u32 %v2513_v27, %v2391_v29 }
 0x72b   : > { %v1624_v43 = vmul.f32 %v1620_v34, %v1574_v63  ;;  %v2511_v34 = vld [vmem:[%s3331_s14 + $0x24] sm:$0xf] }
 0x72c   : > { %v1625_v19 = vmul.f32 %v1621_v37, %v1588_v0  ;;  %v2522_v0 = vld [vmem:[%s3331_s14 + $0x74] sm:$0xf0]  ;;  %v2383_v37 = vld [vmem:[%s3331_s14 + $0x28] sm:$0xf0] }
 0x72d   : > { %1959 = vmatpush.bf16.msra.mxu3 %v2394_v32 }
 0x72e   : > { %v2587_v45 = vpop.eup %2586 }
 0x72f   : > { %v2589_v33 = vpop.eup %2588  ;;  %v1618_v36 = vadd.f32 1.0, %v2587_v45  ;;  %v2381_v45 = vld [vmem:[%s3331_s14 + $0x20] sm:$0xf] }
 0x730   : > { %v1619_v39 = vadd.f32 1.0, %v2589_v33  ;;  %v2512_v33 = vld [vmem:[%s3331_s14 + $0x24] sm:$0xf0] }
 0x731   : > { %v1622_v40 = vmul.f32 0.5, %v1618_v36  ;;  %v2382_v36 = vor.u32 %v2512_v33, %v2381_v45 }
 0x732   : > { %v1623_v42 = vmul.f32 0.5, %v1619_v39  ;;  %v2386_v39 = vor.u32 %v2511_v34, %v2383_v37 }
 0x733   : > { %v1626_v44 = vmul.f32 %v1622_v40, %v1576_v11  ;;  %v2405_v11 = vld [vmem:[%s3331_s14 + $0x50] sm:$0xf] }
 0x734   : > { %v1627_v46 = vmul.f32 %v1623_v42, %v1590_v14  ;;  %v2518_v14 = vld [vmem:[%s3331_s14 + $0x54] sm:$0xf0]  ;;  %1960 = vmatpush.bf16.msra.mxu3 %v2386_v39  ;;  %v2373_v40 = vld [vmem:[%s3331_s14 + $0x10] sm:$0xf] }
 0x735   : > { %v1628_v13 = vpack.c.bf16 %v1626_v44, %v1624_v43  ;;  %v2406_v17 = vor.u32 %v2518_v14, %v2405_v11  ;;  %v2510_v42 = vld [vmem:[%s3331_s14 + $0x14] sm:$0xf0]  ;;  %v2509_v43 = vld [vmem:[%s3331_s14 + $0x14] sm:$0xf] }
 0x736   : > { %v1629_v22 = vpack.c.bf16 %v1627_v46, %v1625_v19  ;;  %v2374_v44 = vor.u32 %v2510_v42, %v2373_v40  ;;  %v2375_v19 = vld [vmem:[%s3331_s14 + $0x18] sm:$0xf0]  ;;  %v2365_v46 = vld [vmem:[%s3331_s14] sm:$0xf] }
 0x737   : > { %1770 = vmatmul.bf16.vlgmr.msra.gmra.mxu0 %v1628_v13  ;;  %v2508_v13 = vld [vmem:[%s3331_s14 + $0x4] sm:$0xf0] }
 0x738   : > { %1784 = vmatmul.bf16.vlgmr.msra.gmra.mxu1 %v1629_v22 }
 0x7b4   : > { %v1771_v48 = vpop.f32.mrf.mxu0 }
 0x7b5   : > { %v1772_v49 = vadd.f32 %v2539_v47, %v1771_v48  ;;  %v1785_v50 = vpop.f32.mrf.mxu1  ;;  %v2507_v48 = vld [vmem:[%s3331_s14 + $0x4] sm:$0xf] }
 0x7b7   : > { %v1786_v51 = vadd.f32 %v1785_v50, %v1772_v49  ;;  %v2367_v49 = vld [vmem:[%s3331_s14 + $0x8] sm:$0xf0] }
 0x7b9   : > { %v1790_v52 = vadd.f32 %v1786_v51, %v3017_v12  ;;  %v2366_v51 = vor.u32 %v2508_v13, %v2365_v46 }
 0x7bb   : > { %1792 = vadd.xlane.f32.xlu0 %v1790_v52 }
 0x7bc   : > { %v1773_v53 = vpop.f32.mrf.mxu0 }
 0x7bd   : > { %v1774_v54 = vadd.f32 %v2539_v47, %v1773_v53  ;;  %v1787_v55 = vpop.f32.mrf.mxu1  ;;  %v2378_v47 = vor.u32 %v2509_v43, %v2375_v19 }
 0x7bf   : > { %v1788_v56 = vadd.f32 %v1787_v55, %v1774_v54  ;;  %1961 = vmatpush.bf16.msra.mxu3 %v2378_v47 }
 0x7c1   : > { %v1791_v57 = vadd.f32 %v1788_v56, %v3021_v16  ;;  %v2421_v16 = vld [vmem:[%s3331_s14 + $0x70] sm:$0xf] }
 0x7c2   : > { %v2422_v2 = vor.u32 %v2522_v0, %v2421_v16 }
 0x7c3   : > { %1794 = vadd.xlane.f32.xlu2 %v1791_v57 }
 0x7c4   : > { %1941 = vmatpush.bf16.msra.mxu2 %v2422_v2 }
 0x7c8   : > { %1942 = vmatpush.bf16.msra.mxu2 %v2414_v8 }
 0x7cc   : > { %1943 = vmatpush.bf16.msra.mxu2 %v2406_v17 }
 0x7d0   : > { %1944 = vmatpush.bf16.msra.mxu2 %v2398_v23 }
 0x7d4   : > { %1945 = vmatpush.bf16.msra.mxu2 %v2390_v28 }
 0x7d8   : > { %1946 = vmatpush.bf16.msra.mxu2 %v2382_v36 }
 0x7dc   : > { %1947 = vmatpush.bf16.msra.mxu2 %v2374_v44 }
 0x7e0   : > { %1948 = vmatpush.bf16.msra.mxu2 %v2366_v51 }
 0x82e   : > { %v1793_v58 = vpop.xlane.xlu0 %1792 }
 0x82f   : > { %v1796_v35 = vmul.f32 %v1793_v58, %v2766_v38 }
 0x831   : > { %v3195_v59 = vsub.f32 %v1790_v52, %v1796_v35  ;;  %v2370_v52 = vor.u32 %v2507_v48, %v2367_v49 }
 0x833   : > { %v1800_v60 = vmul.f32 %v3195_v59, %v3195_v59  ;;  %1962 = vmatpush.bf16.msra.mxu3 %v2370_v52 }
 0x835   : > { %1802 = vadd.xlane.f32.xlu1 %v1800_v60 }
 0x836   : > { %v1795_v61 = vpop.xlane.xlu2 %1794 }
 0x837   : > { %v1797_v12 = vmul.f32 %v1795_v61, %v2766_v38 }
 0x839   : > { %v3200_v62 = vsub.f32 %v1791_v57, %v1797_v12 }
 0x83b   : > { %v1801_v63 = vmul.f32 %v3200_v62, %v3200_v62 }
 0x83d   : > { %1804 = vadd.xlane.f32.xlu0 %v1801_v63 }
 0x8a8   : > { %v1803_v22 = vpop.xlane.xlu1 %1802 }
 0x8a9   : > { %v1806_v50 = vmul.f32 %v1803_v22, %v2766_v38 }
 0x8ab   : > { %v1808_v53 = vadd.f32 1e-05, %v1806_v50 }
 0x8ad   : > { %2590 = vrsqrt.f32 %v1808_v53  ;;  %vm1816_vm6 = vweird.f32 %v1808_v53 }
 0x8b0   : > { %v1805_v54 = vpop.xlane.xlu0 %1804 }
 0x8b1   : > { %v1807_v55 = vmul.f32 %v1805_v54, %v2766_v38 }
 0x8b3   : > { %v2591_v56 = vpop.eup %2590  ;;  %v1809_v57 = vadd.f32 1e-05, %v1807_v55 }
 0x8b4   : > { %v1811_v58 = vmul.f32 %v2591_v56, %v1808_v53  ;;  %vm1817_vm5 = vweird.f32 %v2591_v56 }
 0x8b5   : > { %2592 = vrsqrt.f32 %v1809_v57  ;;  %vm1818_vm7 = vmor %vm1816_vm6, %vm1817_vm5  ;;  %vm1826_vm9 = vweird.f32 %v1809_v57 }
 0x8b6   : > { %v1812_v35 = vmul.f32 %v2591_v56, %v1811_v58 }
 0x8b8   : > { %v1813_v60 = vmul.f32 0.5, %v1812_v35 }
 0x8ba   : > { %v1814_v61 = vsub.f32 1.5, %v1813_v60 }
 0x8bb   : > { %v2593_v12 = vpop.eup %2592 }
 0x8bc   : > { %v1815_v63 = vmul.f32 %v2591_v56, %v1814_v61  ;;  %v1821_v16 = vmul.f32 %v2593_v12, %v1809_v57  ;;  %vm1827_vm8 = vweird.f32 %v2593_v12 }
 0x8bd   : > { %vm1828_vm10 = vmor %vm1826_vm9, %vm1827_vm8 }
 0x8be   : > { %v1822_v0 = vmul.f32 %v2593_v12, %v1821_v16  ;;  %v1819_v1 = vsel %vm1818_vm7, %v2591_v56, %v1815_v63 }
 0x8bf   : > { %v1830_v38 = vmul.f32 %v1819_v1, %v3195_v59  ;;  %v1855_v59 = vld [vmem:[%s3332_s15] sm:$0x3] }
 0x8c0   : > { %v1823_v2 = vmul.f32 0.5, %v1822_v0  ;;  %v1857_v18 = vperm.slane %v1855_v59, 0  ;;  %v1858_v20 = vperm.slane %v1855_v59, 1 }
 0x8c1   : > { %v1833_v9 = vmul.f32 %v1832_v5, %v1830_v38 }
 0x8c2   : > { %v1824_v3 = vsub.f32 1.5, %v1823_v2 }
 0x8c3   : > { %v1836_v14 = vadd.f32 %v1835_v10, %v1833_v9 }
 0x8c4   : > { %v1825_v6 = vmul.f32 %v2593_v12, %v1824_v3 }
 0x8c6   : > { %v1829_v7 = vsel %vm1828_vm10, %v2593_v12, %v1825_v6 }
 0x8c7   : > { %v1831_v8 = vmul.f32 %v1829_v7, %v3200_v62 }
 0x8c9   : > { %v1834_v11 = vmul.f32 %v1832_v5, %v1831_v8 }
 0x8cb   : > { %v1837_v15 = vadd.f32 %v1835_v10, %v1834_v11 }
 0x8cd   : > { %v1838_v17 = vpack.c.bf16 %v1837_v15, %v1836_v14 }
 0x8cf   : > { %1949 = vmatmul.bf16.vlgmr.msra.gmra.mxu2 %v1838_v17  ;;  %1963 = vmatmul.bf16.vlgmr.msra.gmra.mxu3 %v1838_v17 }
 0x952   : > { %v1950_v62 = vpop.f32.mrf.mxu2  ;;  %v1964_v30 = vpop.f32.mrf.mxu3 }
 0x953   : > { %v1951_v21 = vadd.f32 %v1950_v62, %v1857_v18  ;;  %v1965_v31 = vadd.f32 %v1964_v30, %v1858_v20 }
 0x955   : > { %1969 = vst [vmem:[%s538_s29] sm:$0xff] %v1951_v21 }
 0x956   : > { %1970 = vst [vmem:[%s538_s29 + $0x8] sm:$0xff] %v1965_v31 }
 0x95a   : > { %v1952_v23 = vpop.f32.mrf.mxu2  ;;  %v1966_v24 = vpop.f32.mrf.mxu3 }
 0x95b   : > { %v1953_v25 = vadd.f32 %v1952_v23, %v1857_v18  ;;  %v1967_v26 = vadd.f32 %v1966_v24, %v1858_v20 }
 0x95d   : > { %1971 = vst [vmem:[%s538_s29 + $0x10] sm:$0xff] %v1953_v25 }
 0x95e   : > { %1972 = vst [vmem:[%s538_s29 + $0x18] sm:$0xff] %v1967_v26 }
 0x95f PF: > { %s26_s21 = sadd.s32 1, %s2601_s21  }
 0x960   : > { %p23_p4 = scmp.ge.s32.totalorder %s26_s21, 4  }
 0x962   :  { %25 = sbr.rel (!%p23_p4) target bundleno = 2 (0x2), region = 117 }

</bundles_post_ra>
